<compile_context>
chip_gen: v7x
topology: tpu7x:2x2x1
jax: 0.10.0
libtpu: 0.0.40
codegen_flags: <defaults>
</compile_context>

<pallas_src>
import jax
import jax.numpy as jnp
from jax.experimental import pallas as pl
from jax.experimental.pallas import tpu as pltpu

# ----------------------------- model config ---------------------------------
BRANCH_INPUT_DIM = 8
NOMAD_SECONDARY_INPUT_DIM = 4
NOMAD_OUTPUT_DIM = 4
BRANCH_HIDDEN_DIM = 32
NOMAD_HIDDEN_DIM = 32
BRANCH_HIDDEN_LAYERS = 2
NOMAD_HIDDEN_LAYERS = 2
N_TERMS = 8
BATCH = 1000         # demo batch (non-multiple of the tile to exercise grid + padding)

PAD = 32             # all layer in/out widths are zero-padded to this common feat width
MAX_TILE_N = 512     # batch columns (lanes) per grid step, multiple of 128

# TODO(synk): the PyTorch module takes `activation` as a constructor argument; fixed to tanh here.
ACT = jnp.tanh


def _mlp_layer_dims(input_dim, hidden_dim, output_dim, hidden_layers):
    """Mirror BranchNet/NOMAD.__init__: Linear(in,h), hidden_layers x Linear(h,h), Linear(h,out)."""
    dims = [(input_dim, hidden_dim)]
    for _ in range(hidden_layers):
        dims.append((hidden_dim, hidden_dim))
    dims.append((hidden_dim, output_dim))
    return dims


BRANCH_DIMS = _mlp_layer_dims(BRANCH_INPUT_DIM, BRANCH_HIDDEN_DIM, N_TERMS,
                              BRANCH_HIDDEN_LAYERS)
NOMAD_DIMS = _mlp_layer_dims(N_TERMS + NOMAD_SECONDARY_INPUT_DIM,
                             NOMAD_HIDDEN_DIM, NOMAD_OUTPUT_DIM,
                             NOMAD_HIDDEN_LAYERS)
N_BRANCH_LAYERS = len(BRANCH_DIMS)
N_NOMAD_LAYERS = len(NOMAD_DIMS)
N_LAYERS_TOTAL = N_BRANCH_LAYERS + N_NOMAD_LAYERS


def _round_up(n, m):
    return ((n + m - 1) // m) * m


# ------------------------------ Pallas kernel --------------------------------
def neubernet_kernel(x_ref, w_ref, wsec_ref, b_ref, o_ref):
    """Transposed (feature-major) layout; batch on lanes.

    x_ref:    (PAD, TN) padded input tile. Rows 0..7 = branch input, rows 8..11 =
              secondary NOMAD input, remaining rows exactly 0.
    w_ref:    (N_LAYERS_TOTAL, PAD, PAD) zero-padded transposed weights (out x in).
              The first NOMAD layer slot holds only the branch-output input-columns;
              its secondary-input columns live in wsec_ref.
    wsec_ref: (PAD, PAD) zero-padded secondary part of the first NOMAD weight,
              aligned to the x row layout.
    b_ref:    (N_LAYERS_TOTAL, PAD, 1) zero-padded biases (broadcast along lanes).
    o_ref:    (PAD, TN) padded output tile (only rows 0..NOMAD_OUTPUT_DIM-1 are real).
    """
    x_t = x_ref[...]                         # (PAD, TN) f32, lane-dense
    h = x_t

    # --- BranchNet: activation on all layers except the last -----------------
    # Padded weight rows/cols are zero, so the secondary-input rows of x_t
    # contribute nothing and padded output rows stay exactly zero.
    for layer in range(N_BRANCH_LAYERS):
        h = jnp.dot(w_ref[layer], h, preferred_element_type=jnp.float32) + b_ref[layer]
        if layer < N_BRANCH_LAYERS - 1:
            h = ACT(h)
    # h: (PAD, TN); rows >= N_TERMS are exactly zero (branch output, no final act).

    # --- first NOMAD layer: concat-free (split weight) ------------------------
    l0 = N_BRANCH_LAYERS
    z = (jnp.dot(w_ref[l0], h, preferred_element_type=jnp.float32)
         + jnp.dot(wsec_ref[...], x_t, preferred_element_type=jnp.float32)
         + b_ref[l0])
    z = ACT(z)

    # --- remaining NOMAD layers: activation on all but the last --------------
    for layer in range(l0 + 1, l0 + N_NOMAD_LAYERS):
        z = jnp.dot(w_ref[layer], z, preferred_element_type=jnp.float32) + b_ref[layer]
        if layer < l0 + N_NOMAD_LAYERS - 1:
            z = ACT(z)

    o_ref[...] = z.astype(o_ref.dtype)


# --------------------------- parameter packing --------------------------------
def pack_params(params):
    """Pack flat [w0, b0, w1, b1, ...] (w: (in,out), b: (out,)) into padded transposed slabs."""
    all_dims = BRANCH_DIMS + NOMAD_DIMS
    w_pack = jnp.zeros((N_LAYERS_TOTAL, PAD, PAD), jnp.float32)   # (layer, out, in)
    b_pack = jnp.zeros((N_LAYERS_TOTAL, PAD, 1), jnp.float32)
    w_sec = jnp.zeros((PAD, PAD), jnp.float32)
    for layer, (fan_in, fan_out) in enumerate(all_dims):
        w = params[2 * layer]                      # (fan_in, fan_out)
        b = params[2 * layer + 1].reshape(-1)
        wt = w.T                                   # (fan_out, fan_in)
        if layer == N_BRANCH_LAYERS:
            # First NOMAD layer: split into (branch-output cols) + (secondary cols).
            w_pack = w_pack.at[layer, :fan_out, :N_TERMS].set(wt[:, :N_TERMS])
            w_sec = w_sec.at[
                :fan_out,
                BRANCH_INPUT_DIM:BRANCH_INPUT_DIM + NOMAD_SECONDARY_INPUT_DIM].set(
                    wt[:, N_TERMS:])
        else:
            w_pack = w_pack.at[layer, :fan_out, :fan_in].set(wt)
        b_pack = b_pack.at[layer, :fan_out, 0].set(b)
    return w_pack, w_sec, b_pack


# ------------------------------ forward wrapper -------------------------------
def neubernet_forward(x, params, *, max_tile_n=MAX_TILE_N):
    """x: (B, branch_in + secondary_in) f32; params: flat list of (W, b) pairs."""
    B, F = x.shape
    assert F == BRANCH_INPUT_DIM + NOMAD_SECONDARY_INPUT_DIM

    w_pack, w_sec, b_pack = pack_params(params)

    tn = min(max_tile_n, _round_up(B, 128))        # lane tile, multiple of 128
    b_pad = _round_up(B, tn)
    # Feature-major padded input: (PAD, b_pad), batch on lanes.
    xt_pad = jnp.zeros((PAD, b_pad), jnp.float32).at[:F, :B].set(x.T)

    grid = (b_pad // tn,)
    out_pad = pl.pallas_call(
        neubernet_kernel,
        out_shape=jax.ShapeDtypeStruct((PAD, b_pad), jnp.float32),
        grid=grid,
        in_specs=[
            pl.BlockSpec((PAD, tn), lambda i: (0, i)),                       # x tile
            pl.BlockSpec((N_LAYERS_TOTAL, PAD, PAD), lambda i: (0, 0, 0)),   # weights (resident)
            pl.BlockSpec((PAD, PAD), lambda i: (0, 0)),                      # secondary weight
            pl.BlockSpec((N_LAYERS_TOTAL, PAD, 1), lambda i: (0, 0, 0)),     # biases (resident)
        ],
        out_specs=pl.BlockSpec((PAD, tn), lambda i: (0, i)),
        compiler_params=pltpu.CompilerParams(
            dimension_semantics=("parallel",)),
    )(xt_pad, w_pack, w_sec, b_pack)

    return out_pad[:NOMAD_OUTPUT_DIM, :B].T


# --------------------------- parameter initialization ------------------------
def init_params(key):
    """Deterministic weights/biases. W stored as (in_dim, out_dim); b as (out_dim,)."""
    params = []
    for (fan_in, fan_out) in BRANCH_DIMS + NOMAD_DIMS:
        key, kw, kb = jax.random.split(key, 3)
        bound = 1.0 / jnp.sqrt(fan_in)
        w = jax.random.uniform(kw, (fan_in, fan_out), jnp.float32, -bound, bound)
        b = jax.random.uniform(kb, (fan_out,), jnp.float32, -bound, bound)
        params += [w, b]
    return params


def reference_forward(x, params):
    """Pure-JAX reference mirroring the PyTorch forward (with the explicit concat)."""
    branch_params = params[: 2 * N_BRANCH_LAYERS]
    nomad_params = params[2 * N_BRANCH_LAYERS:]
    h = x[:, :BRANCH_INPUT_DIM]
    for layer in range(N_BRANCH_LAYERS):
        h = h @ branch_params[2 * layer] + branch_params[2 * layer + 1]
        if layer < N_BRANCH_LAYERS - 1:
            h = ACT(h)
    z = jnp.concatenate([h, x[:, BRANCH_INPUT_DIM:]], axis=1)
    for layer in range(N_NOMAD_LAYERS):
        z = z @ nomad_params[2 * layer] + nomad_params[2 * layer + 1]
        if layer < N_NOMAD_LAYERS - 1:
            z = ACT(z)
    return z


# ----------------------------------- main ------------------------------------
if __name__ == "__main__":
    key = jax.random.PRNGKey(0)
    key, kx, kp = jax.random.split(key, 3)

    x = jax.random.normal(
        kx, (BATCH, BRANCH_INPUT_DIM + NOMAD_SECONDARY_INPUT_DIM), jnp.float32)
    params = init_params(kp)

    out = neubernet_forward(x, params)
    out = jax.block_until_ready(out)

    ref = reference_forward(x, params)
    assert out.shape == (BATCH, NOMAD_OUTPUT_DIM)
    assert jnp.allclose(out, ref, atol=1e-4, rtol=1e-4), "mismatch vs reference"

    print("KERNEL_OK")
</pallas_src>

<mosaic_0001>
module attributes {stable_mosaic.version = 11 : i64} {
  func.func @neubernet_kernel(%arg0: i32, %arg1: memref<32x512xf32, #tpu.memory_space<vmem>>, %arg2: memref<8x32x32xf32, #tpu.memory_space<vmem>>, %arg3: memref<32x32xf32, #tpu.memory_space<vmem>>, %arg4: memref<8x32x1xf32, #tpu.memory_space<vmem>>, %arg5: memref<32x512xf32, #tpu.memory_space<vmem>>) attributes {dimension_semantics = [#tpu.dimension_semantics<parallel>], iteration_bounds = array<i64: 2>, scalar_prefetch = 0 : i64, scratch_operands = 0 : i64, tpu.core_type = #tpu.core_type<tc>, window_params = [{transform_indices = @transform_0, window_bounds = array<i64: 32, 512>}, {pipeline_mode = #tpu.pipeline_mode<synchronous>, transform_indices = @transform_1, window_bounds = array<i64: 8, 32, 32>}, {pipeline_mode = #tpu.pipeline_mode<synchronous>, transform_indices = @transform_2, window_bounds = array<i64: 32, 32>}, {pipeline_mode = #tpu.pipeline_mode<synchronous>, transform_indices = @transform_3, window_bounds = array<i64: 8, 32, 1>}, {transform_indices = @transform_4, window_bounds = array<i64: 32, 512>}]} {
    %c0 = arith.constant 0 : index
    %c0_0 = arith.constant 0 : index
    %0 = vector.load %arg1[%c0, %c0_0] : memref<32x512xf32, #tpu.memory_space<vmem>>, vector<32x512xf32>
    %c0_1 = arith.constant 0 : index
    %c0_2 = arith.constant 0 : index
    %c0_3 = arith.constant 0 : index
    %1 = vector.load %arg2[%c0_1, %c0_2, %c0_3] : memref<8x32x32xf32, #tpu.memory_space<vmem>>, vector<1x32x32xf32>
    %2 = vector.shape_cast %1 : vector<1x32x32xf32> to vector<32x32xf32>
    %cst = arith.constant dense<0.000000e+00> : vector<32x512xf32>
    %3 = tpu.matmul %2, %0, %cst {dimension_numbers = #tpu.dot_dimension_numbers<[1], [0], [0], [1], [0, 0, 1, 1], [], []>} : vector<32x32xf32>, vector<32x512xf32>, vector<32x512xf32> -> vector<32x512xf32>
    %c0_4 = arith.constant 0 : index
    %c0_5 = arith.constant 0 : index
    %c0_6 = arith.constant 0 : index
    %4 = vector.load %arg4[%c0_4, %c0_5, %c0_6] : memref<8x32x1xf32, #tpu.memory_space<vmem>>, vector<1x32x1xf32>
    %5 = vector.shape_cast %4 : vector<1x32x1xf32> to vector<32x1xf32>
    %6 = vector.broadcast %5 : vector<32x1xf32> to vector<32x512xf32>
    %7 = arith.addf %3, %6 : vector<32x512xf32>
    %8 = math.tanh %7 : vector<32x512xf32>
    %c1 = arith.constant 1 : index
    %c0_7 = arith.constant 0 : index
    %c0_8 = arith.constant 0 : index
    %9 = vector.load %arg2[%c1, %c0_7, %c0_8] : memref<8x32x32xf32, #tpu.memory_space<vmem>>, vector<1x32x32xf32>
    %10 = vector.shape_cast %9 : vector<1x32x32xf32> to vector<32x32xf32>
    %cst_9 = arith.constant dense<0.000000e+00> : vector<32x512xf32>
    %11 = tpu.matmul %10, %8, %cst_9 {dimension_numbers = #tpu.dot_dimension_numbers<[1], [0], [0], [1], [0, 0, 1, 1], [], []>} : vector<32x32xf32>, vector<32x512xf32>, vector<32x512xf32> -> vector<32x512xf32>
    %c1_10 = arith.constant 1 : index
    %c0_11 = arith.constant 0 : index
    %c0_12 = arith.constant 0 : index
    %12 = vector.load %arg4[%c1_10, %c0_11, %c0_12] : memref<8x32x1xf32, #tpu.memory_space<vmem>>, vector<1x32x1xf32>
    %13 = vector.shape_cast %12 : vector<1x32x1xf32> to vector<32x1xf32>
    %14 = vector.broadcast %13 : vector<32x1xf32> to vector<32x512xf32>
    %15 = arith.addf %11, %14 : vector<32x512xf32>
    %16 = math.tanh %15 : vector<32x512xf32>
    %c2 = arith.constant 2 : index
    %c0_13 = arith.constant 0 : index
    %c0_14 = arith.constant 0 : index
    %17 = vector.load %arg2[%c2, %c0_13, %c0_14] : memref<8x32x32xf32, #tpu.memory_space<vmem>>, vector<1x32x32xf32>
    %18 = vector.shape_cast %17 : vector<1x32x32xf32> to vector<32x32xf32>
    %cst_15 = arith.constant dense<0.000000e+00> : vector<32x512xf32>
    %19 = tpu.matmul %18, %16, %cst_15 {dimension_numbers = #tpu.dot_dimension_numbers<[1], [0], [0], [1], [0, 0, 1, 1], [], []>} : vector<32x32xf32>, vector<32x512xf32>, vector<32x512xf32> -> vector<32x512xf32>
    %c2_16 = arith.constant 2 : index
    %c0_17 = arith.constant 0 : index
    %c0_18 = arith.constant 0 : index
    %20 = vector.load %arg4[%c2_16, %c0_17, %c0_18] : memref<8x32x1xf32, #tpu.memory_space<vmem>>, vector<1x32x1xf32>
    %21 = vector.shape_cast %20 : vector<1x32x1xf32> to vector<32x1xf32>
    %22 = vector.broadcast %21 : vector<32x1xf32> to vector<32x512xf32>
    %23 = arith.addf %19, %22 : vector<32x512xf32>
    %24 = math.tanh %23 : vector<32x512xf32>
    %c3 = arith.constant 3 : index
    %c0_19 = arith.constant 0 : index
    %c0_20 = arith.constant 0 : index
    %25 = vector.load %arg2[%c3, %c0_19, %c0_20] : memref<8x32x32xf32, #tpu.memory_space<vmem>>, vector<1x32x32xf32>
    %26 = vector.shape_cast %25 : vector<1x32x32xf32> to vector<32x32xf32>
    %cst_21 = arith.constant dense<0.000000e+00> : vector<32x512xf32>
    %27 = tpu.matmul %26, %24, %cst_21 {dimension_numbers = #tpu.dot_dimension_numbers<[1], [0], [0], [1], [0, 0, 1, 1], [], []>} : vector<32x32xf32>, vector<32x512xf32>, vector<32x512xf32> -> vector<32x512xf32>
    %c3_22 = arith.constant 3 : index
    %c0_23 = arith.constant 0 : index
    %c0_24 = arith.constant 0 : index
    %28 = vector.load %arg4[%c3_22, %c0_23, %c0_24] : memref<8x32x1xf32, #tpu.memory_space<vmem>>, vector<1x32x1xf32>
    %29 = vector.shape_cast %28 : vector<1x32x1xf32> to vector<32x1xf32>
    %30 = vector.broadcast %29 : vector<32x1xf32> to vector<32x512xf32>
    %31 = arith.addf %27, %30 : vector<32x512xf32>
    %c4 = arith.constant 4 : index
    %c0_25 = arith.constant 0 : index
    %c0_26 = arith.constant 0 : index
    %32 = vector.load %arg2[%c4, %c0_25, %c0_26] : memref<8x32x32xf32, #tpu.memory_space<vmem>>, vector<1x32x32xf32>
    %33 = vector.shape_cast %32 : vector<1x32x32xf32> to vector<32x32xf32>
    %cst_27 = arith.constant dense<0.000000e+00> : vector<32x512xf32>
    %34 = tpu.matmul %33, %31, %cst_27 {dimension_numbers = #tpu.dot_dimension_numbers<[1], [0], [0], [1], [0, 0, 1, 1], [], []>} : vector<32x32xf32>, vector<32x512xf32>, vector<32x512xf32> -> vector<32x512xf32>
    %c0_28 = arith.constant 0 : index
    %c0_29 = arith.constant 0 : index
    %35 = vector.load %arg3[%c0_28, %c0_29] : memref<32x32xf32, #tpu.memory_space<vmem>>, vector<32x32xf32>
    %cst_30 = arith.constant dense<0.000000e+00> : vector<32x512xf32>
    %36 = tpu.matmul %35, %0, %cst_30 {dimension_numbers = #tpu.dot_dimension_numbers<[1], [0], [0], [1], [0, 0, 1, 1], [], []>} : vector<32x32xf32>, vector<32x512xf32>, vector<32x512xf32> -> vector<32x512xf32>
    %37 = arith.addf %34, %36 : vector<32x512xf32>
    %c4_31 = arith.constant 4 : index
    %c0_32 = arith.constant 0 : index
    %c0_33 = arith.constant 0 : index
    %38 = vector.load %arg4[%c4_31, %c0_32, %c0_33] : memref<8x32x1xf32, #tpu.memory_space<vmem>>, vector<1x32x1xf32>
    %39 = vector.shape_cast %38 : vector<1x32x1xf32> to vector<32x1xf32>
    %40 = vector.broadcast %39 : vector<32x1xf32> to vector<32x512xf32>
    %41 = arith.addf %37, %40 : vector<32x512xf32>
    %42 = math.tanh %41 : vector<32x512xf32>
    %c5 = arith.constant 5 : index
    %c0_34 = arith.constant 0 : index
    %c0_35 = arith.constant 0 : index
    %43 = vector.load %arg2[%c5, %c0_34, %c0_35] : memref<8x32x32xf32, #tpu.memory_space<vmem>>, vector<1x32x32xf32>
    %44 = vector.shape_cast %43 : vector<1x32x32xf32> to vector<32x32xf32>
    %cst_36 = arith.constant dense<0.000000e+00> : vector<32x512xf32>
    %45 = tpu.matmul %44, %42, %cst_36 {dimension_numbers = #tpu.dot_dimension_numbers<[1], [0], [0], [1], [0, 0, 1, 1], [], []>} : vector<32x32xf32>, vector<32x512xf32>, vector<32x512xf32> -> vector<32x512xf32>
    %c5_37 = arith.constant 5 : index
    %c0_38 = arith.constant 0 : index
    %c0_39 = arith.constant 0 : index
    %46 = vector.load %arg4[%c5_37, %c0_38, %c0_39] : memref<8x32x1xf32, #tpu.memory_space<vmem>>, vector<1x32x1xf32>
    %47 = vector.shape_cast %46 : vector<1x32x1xf32> to vector<32x1xf32>
    %48 = vector.broadcast %47 : vector<32x1xf32> to vector<32x512xf32>
    %49 = arith.addf %45, %48 : vector<32x512xf32>
    %50 = math.tanh %49 : vector<32x512xf32>
    %c6 = arith.constant 6 : index
    %c0_40 = arith.constant 0 : index
    %c0_41 = arith.constant 0 : index
    %51 = vector.load %arg2[%c6, %c0_40, %c0_41] : memref<8x32x32xf32, #tpu.memory_space<vmem>>, vector<1x32x32xf32>
    %52 = vector.shape_cast %51 : vector<1x32x32xf32> to vector<32x32xf32>
    %cst_42 = arith.constant dense<0.000000e+00> : vector<32x512xf32>
    %53 = tpu.matmul %52, %50, %cst_42 {dimension_numbers = #tpu.dot_dimension_numbers<[1], [0], [0], [1], [0, 0, 1, 1], [], []>} : vector<32x32xf32>, vector<32x512xf32>, vector<32x512xf32> -> vector<32x512xf32>
    %c6_43 = arith.constant 6 : index
    %c0_44 = arith.constant 0 : index
    %c0_45 = arith.constant 0 : index
    %54 = vector.load %arg4[%c6_43, %c0_44, %c0_45] : memref<8x32x1xf32, #tpu.memory_space<vmem>>, vector<1x32x1xf32>
    %55 = vector.shape_cast %54 : vector<1x32x1xf32> to vector<32x1xf32>
    %56 = vector.broadcast %55 : vector<32x1xf32> to vector<32x512xf32>
    %57 = arith.addf %53, %56 : vector<32x512xf32>
    %58 = math.tanh %57 : vector<32x512xf32>
    %c7 = arith.constant 7 : index
    %c0_46 = arith.constant 0 : index
    %c0_47 = arith.constant 0 : index
    %59 = vector.load %arg2[%c7, %c0_46, %c0_47] : memref<8x32x32xf32, #tpu.memory_space<vmem>>, vector<1x32x32xf32>
    %60 = vector.shape_cast %59 : vector<1x32x32xf32> to vector<32x32xf32>
    %cst_48 = arith.constant dense<0.000000e+00> : vector<32x512xf32>
    %61 = tpu.matmul %60, %58, %cst_48 {dimension_numbers = #tpu.dot_dimension_numbers<[1], [0], [0], [1], [0, 0, 1, 1], [], []>} : vector<32x32xf32>, vector<32x512xf32>, vector<32x512xf32> -> vector<32x512xf32>
    %c7_49 = arith.constant 7 : index
    %c0_50 = arith.constant 0 : index
    %c0_51 = arith.constant 0 : index
    %62 = vector.load %arg4[%c7_49, %c0_50, %c0_51] : memref<8x32x1xf32, #tpu.memory_space<vmem>>, vector<1x32x1xf32>
    %63 = vector.shape_cast %62 : vector<1x32x1xf32> to vector<32x1xf32>
    %64 = vector.broadcast %63 : vector<32x1xf32> to vector<32x512xf32>
    %65 = arith.addf %61, %64 : vector<32x512xf32>
    %c0_52 = arith.constant 0 : index
    %c0_53 = arith.constant 0 : index
    %66 = vector.load %arg5[%c0_52, %c0_53] : memref<32x512xf32, #tpu.memory_space<vmem>>, vector<32x512xf32>
    tpu.vector_store %arg5[%c0_52, %c0_53], %65 {strides = array<i32>} : memref<32x512xf32, #tpu.memory_space<vmem>>, vector<32x512xf32>,
    return
  }
  func.func @transform_0(%arg0: i32) -> (i32, i32) {
    %c0_i32 = arith.constant 0 : i32
    %c0_i32_0 = arith.constant 0 : i32
    return %c0_i32, %arg0 : i32, i32
  }
  func.func @transform_1(%arg0: i32) -> (i32, i32, i32) {
    %c0_i32 = arith.constant 0 : i32
    %c0_i32_0 = arith.constant 0 : i32
    %c0_i32_1 = arith.constant 0 : i32
    %c0_i32_2 = arith.constant 0 : i32
    return %c0_i32, %c0_i32_0, %c0_i32_1 : i32, i32, i32
  }
  func.func @transform_2(%arg0: i32) -> (i32, i32) {
    %c0_i32 = arith.constant 0 : i32
    %c0_i32_0 = arith.constant 0 : i32
    %c0_i32_1 = arith.constant 0 : i32
    return %c0_i32, %c0_i32_0 : i32, i32
  }
  func.func @transform_3(%arg0: i32) -> (i32, i32, i32) {
    %c0_i32 = arith.constant 0 : i32
    %c0_i32_0 = arith.constant 0 : i32
    %c0_i32_1 = arith.constant 0 : i32
    %c0_i32_2 = arith.constant 0 : i32
    return %c0_i32, %c0_i32_0, %c0_i32_1 : i32, i32, i32
  }
  func.func @transform_4(%arg0: i32) -> (i32, i32) {
    %c0_i32 = arith.constant 0 : i32
    %c0_i32_0 = arith.constant 0 : i32
    return %c0_i32, %arg0 : i32, i32
  }
}

</mosaic_0001>

<bundles_post_ra>
// kernel: tpu_custom_call.1
= control target key start
LH: loop header
LB: loop body
LE: loop exit
PB: predicated region body
PF: predicated region fallthrough
CT: control target
= control target key end

     0   :  { %9 = vsyncpa [#allocation4], 0  ;;  %s3704_s0 = inlined_call_operand.vmem [shape: f32[32,1024], index: 0, kind: input, shape index: {}]   ;;  %s3705_s1 = inlined_call_operand.hbm [shape: f32[8,32,32], index: 1, kind: input, shape index: {}]   ;;  %s3706_s2 = inlined_call_operand.hbm [shape: f32[32,32], index: 2, kind: input, shape index: {}]   ;;  %s3707_s3 = inlined_call_operand.vmem [shape: f32[8,32,1], index: 3, kind: input, shape index: {}]   ;;  %s3708_s4 = inlined_call_operand.hbm [shape: f32[32,1024], index: 4, kind: output, shape index: {}]  }
   0x1   :  { %10 = vsyncpa [#allocation7], 0 }
   0x2   :  { %11 = vsyncpa [#allocation5], 0 }
   0x3   :  { %13 = vsyncpa [#allocation5 + $0x1], 0  ;;  %s3183_s15 = smov 0   ;;  %s3185_s16 = smov 0  }
   0x4   :  { %s3187_s17 = smov 0   ;;  %s3189_s18 = smov 0  }
   0x5 LB: > { %s3204_s19 = sadd.s32 4294967295, %s3146_s18   ;;  %s2479_s20 = sadd.s32 4294967294, %s3146_s18   ;;  %s3146_s18 = sphi %s3189_s18, %s3728_s18   ;;  %s3142_s17 = sphi %s3187_s17, %s3727_s17   ;;  %s3138_s16 = sphi %s3185_s16, %s3726_s16   ;;  %s3134_s15 = sphi %s3183_s15, %s3725_s15  }
   0x6   : > { %s3208_s21 = sadd.s32 1, %s3146_s18   ;;  %s26_s22 = sadd.s32 1, %s3142_s17 }
   0x7   : > { %s23_s23 = ssub.s32 %s3146_s18, %s3208_s21  ;;  %p33_p0 = scmp.ne.s32.totalorder %s3142_s17, %s3138_s16 }
   0x8   : > { %p24_p1 = scmp.eq.s32.totalorder %s23_s23, 0  ;;  %p34_p2 = scmp.eq.s32.totalorder %s3146_s18, 0 }
   0x9   : > { %p126_p3 = scmp.eq.s32.totalorder %s3204_s19, 1  ;;  %p131_p4 = scmp.ne.s32.totalorder %s3138_s16, %s3134_s15 }
   0xa   : > { %s3220_s24 = scalar_select %p24_p1, %s3142_s17, %s26_s22  }
   0xb   : > { %p3222_p5 = por %p34_p2, %p33_p0  ;;  %p3226_p6 = por %p126_p3, %p33_p0 }
   0xc   : > { %p132_p7 = scmp.eq.s32.totalorder %s2479_s20, 1  ;;  %p2480_p8 = scmp.ge.s32.totalorder %s3146_s18, 1 }
   0xd   : > { %s3712_s25 = scalar_select %p3222_p5, 1, 0 }
   0xe   : > { %s3713_s26 = scalar_select %p3226_p6, 1, 0 }
   0xf   : > { %p139_p9 = scmp.lt.s32.totalorder %s3146_s18, 3  ;;  %p3232_p10 = por %p132_p7, %p131_p4 }
  0x10   : > { %p3709_p11 = scmp.eq.s32.totalorder %s3204_s19, 0  ;;  %s3148_s29 = smov [#allocation3]  }
  0x11   : > { %s3714_s27 = scalar_select %p3232_p10, 1, 0 }
  0x12   : > { %p3237_p12 = pnand %p2480_p8, %p139_p9  ;;  %s151_s30 = sshll.u32 %s3148_s29, 4  ;;  %s152_s30 = int_to_ptr.vmem [resolvable:$true] %s151_s30 }
  0x13   : > { %s3149_s6 = smov [#allocation6]   ;;  %s3020_s10 = scalar_lea.hbm %s3705_s1, 4096 }
  0x14   : > { %s3715_s28 = scalar_select %p3237_p12, 1, 0 }
  0x15   : > { %p2769_p13 = pneg %p3237_p12  ;;  %s164_s7 = sshll.u32 %s3149_s6, 4  ;;  %s3249_s7 = int_to_ptr.vmem [resolvable:$true] %s164_s7 }
  0x16   : > { %p3021_p1 = scmp.ne.s32.totalorder %s3705_s1, %s3020_s10  ;;  %p3027_p7 = scmp.lt.u32.totalorder %s3020_s10, %s3705_s1 }
  0x17   : > { %p3245_p0 = pnand %p3709_p11, %p2769_p13 }
  0x19   : > { %p3022_p2 = pneg %p3245_p0 }
  0x1b   : > { %p3023_p3 = pnand %p3022_p2, %p3021_p1 }
  0x1d   : > { %p3024_p4 = pneg %p3023_p3 }
  0x1f   : > { %p3029_p8 = pnand %p3027_p7, %p3024_p4 }
  0x21   : > { %3032 = shalt.err (!%p3029_p8)
}
  0x22   : > { %s3033_s20 = scalar_lea.vmem %s152_s30, 4096  ;;  %p3041_p10 = scmp.lt.s32.totalorder %s152_s30, %s152_s30 }
  0x23   : > { %p3034_p9 = scmp.ne.s32.totalorder %s152_s30, %s3033_s20  ;;  %p3042_p6 = scmp.lt.s32.totalorder %s3033_s20, %s3033_s20 }
  0x25   : > { %p3036_p13 = pnand %p3034_p9, %p3022_p2  ;;  %p3043_p12 = por %p3042_p6, %p3041_p10 }
  0x27   : > { %p3037_p11 = pneg %p3036_p13 }
  0x29   : > { %p3044_p5 = pnand %p3043_p12, %p3037_p11 }
  0x2b   : > { %3047 = shalt.err (!%p3044_p5)
}
  0x2c   : > { %s3150_s22 = smov 128   ;;  %s3151_s23 = smov 8  }
  0x2d   : > { %2772 = dma.hbm_to_vmem [thread:$0]  (!%p3245_p0), %s3705_s1, 4096, %s152_s30, [#allocation4], %s3150_s22, %s3150_s22, %s3151_s23  }
  0x2e   : > { %s3048_s10 = scalar_lea.hbm %s3706_s2, 512 }
  0x2f   : > { %p3049_p1 = scmp.ne.s32.totalorder %s3706_s2, %s3048_s10  ;;  %p3055_p10 = scmp.lt.u32.totalorder %s3048_s10, %s3706_s2 }
  0x31   : > { %p3051_p5 = pnand %p3049_p1, %p3022_p2 }
  0x33   : > { %p3052_p6 = pneg %p3051_p5 }
  0x35   : > { %p3057_p11 = pnand %p3055_p10, %p3052_p6 }
  0x37   : > { %3060 = shalt.err (!%p3057_p11)
}
  0x38   : > { %s3061_s30 = scalar_lea.vmem %s3249_s7, 512  ;;  %p3069_p7 = scmp.lt.s32.totalorder %s3249_s7, %s3249_s7 }
  0x39   : > { %p3062_p12 = scmp.ne.s32.totalorder %s3249_s7, %s3061_s30  ;;  %p3070_p8 = scmp.lt.s32.totalorder %s3061_s30, %s3061_s30 }
  0x3b   : > { %p3064_p3 = pnand %p3062_p12, %p3022_p2  ;;  %p3071_p9 = por %p3070_p8, %p3069_p7 }
  0x3d   : > { %p3065_p4 = pneg %p3064_p3 }
  0x3f   : > { %p3072_p13 = pnand %p3071_p9, %p3065_p4 }
  0x41   : > { %3075 = shalt.err (!%p3072_p13)
}
  0x42   : > { %2775 = dma.hbm_to_vmem [thread:$0]  (!%p3245_p0), %s3706_s2, 512, %s3249_s7, [#allocation7], %s3150_s22, %s3150_s22, %s3151_s23  }
  0x43   : > { %p2483_p1 = scmp.ge.s32.totalorder %s3146_s18, 2 }
  0x44   : > { %p3717_p2 = scmp.ne.s32.totalorder (!%p2483_p1), %s3712_s25, 0 }
  0x45   : > { %177 = sbr.rel (%p2483_p1) target bundleno = 88 (0x58), region = 28 }
  0x4c   : > { %180 = sbr.rel (!%p3717_p2) target bundleno = 88 (0x58), region = 32  ;;  %s182_s6 = sand.u32 (%p3717_p2), 1, %s3142_s17  }
  0x4d   : > { %s2597_s8 = sshll.u32 (%p3717_p2), %s3146_s18, 5  ;;  %s2484_s9 = sshll.u32 (%p3717_p2), %s182_s6, 7 }
  0x4e   : > { %s3308_s11 = scalar_lea.vmem (%p3717_p2), %s3704_s0, %s2597_s8  ;;  %s184_s25 = scalar_lea.vmem (%p3717_p2), [#allocation2], %s2484_s9 }
  0x4f   : > { %v200_v0 = vld [vmem:[%s3308_s11] sm:$0xff] (%p3717_p2)  ;;  %v202_v1 = vld [vmem:[%s3308_s11 + $0x8] sm:$0xff] (%p3717_p2)  ;;  %v204_v2 = vld [vmem:[%s3308_s11 + $0x10] sm:$0xff] (%p3717_p2) }
  0x50   : > { %201 = vst [vmem:[%s184_s25] sm:$0xff] (%p3717_p2), %v200_v0  ;;  %203 = vst [vmem:[%s184_s25 + $0x8] sm:$0xff] (%p3717_p2), %v202_v1  ;;  %v206_v3 = vld [vmem:[%s3308_s11 + $0x18] sm:$0xff] (%p3717_p2)  ;;  %v208_v4 = vld [vmem:[%s3308_s11 + $0x40] sm:$0xff] (%p3717_p2) }
  0x51   : > { %205 = vst [vmem:[%s184_s25 + $0x10] sm:$0xff] (%p3717_p2), %v204_v2  ;;  %v210_v5 = vld [vmem:[%s3308_s11 + $0x48] sm:$0xff] (%p3717_p2)  ;;  %207 = vst [vmem:[%s184_s25 + $0x18] sm:$0xff] (%p3717_p2), %v206_v3  ;;  %v212_v6 = vld [vmem:[%s3308_s11 + $0x50] sm:$0xff] (%p3717_p2) }
  0x52   : > { %209 = vst [vmem:[%s184_s25 + $0x20] sm:$0xff] (%p3717_p2), %v208_v4  ;;  %211 = vst [vmem:[%s184_s25 + $0x28] sm:$0xff] (%p3717_p2), %v210_v5  ;;  %v214_v7 = vld [vmem:[%s3308_s11 + $0x58] sm:$0xff] (%p3717_p2)  ;;  %v216_v8 = vld [vmem:[%s3308_s11 + $0x80] sm:$0xff] (%p3717_p2) }
  0x53   : > { %213 = vst [vmem:[%s184_s25 + $0x30] sm:$0xff] %v212_v6  ;;  %215 = vst [vmem:[%s184_s25 + $0x38] sm:$0xff] %v214_v7  ;;  %v218_v9 = vld [vmem:[%s3308_s11 + $0x88] sm:$0xff]  ;;  %v220_v10 = vld [vmem:[%s3308_s11 + $0x90] sm:$0xff] }
  0x54   : > { %217 = vst [vmem:[%s184_s25 + $0x40] sm:$0xff] %v216_v8  ;;  %v222_v11 = vld [vmem:[%s3308_s11 + $0x98] sm:$0xff]  ;;  %219 = vst [vmem:[%s184_s25 + $0x48] sm:$0xff] %v218_v9  ;;  %v224_v12 = vld [vmem:[%s3308_s11 + $0xc0] sm:$0xff] }
  0x55   : > { %221 = vst [vmem:[%s184_s25 + $0x50] sm:$0xff] %v220_v10  ;;  %223 = vst [vmem:[%s184_s25 + $0x58] sm:$0xff] %v222_v11  ;;  %v226_v13 = vld [vmem:[%s3308_s11 + $0xc8] sm:$0xff]  ;;  %v228_v14 = vld [vmem:[%s3308_s11 + $0xd0] sm:$0xff] }
  0x56   : > { %225 = vst [vmem:[%s184_s25 + $0x60] sm:$0xff] %v224_v12  ;;  %227 = vst [vmem:[%s184_s25 + $0x68] sm:$0xff] %v226_v13  ;;  %v230_v15 = vld [vmem:[%s3308_s11 + $0xd8] sm:$0xff] }
  0x57   : > { %229 = vst [vmem:[%s184_s25 + $0x70] sm:$0xff] %v228_v14  ;;  %231 = vst [vmem:[%s184_s25 + $0x78] sm:$0xff] %v230_v15 }
  0x58 PF: > { %p3718_p0 = scmp.ne.s32.totalorder %s3715_s28, 0 }
  0x59   : > { %s243_s7 = sand.u32 (!%p3718_p0), 1, %s3138_s16   ;;  %p3719_p5 = scmp.eq.s32.totalorder (!%p3718_p0), %s3204_s19, 0 }
  0x5a   : > { %240 = sbr.rel (%p3718_p0) target bundleno = 2060 (0x80c), region = 55  ;;  %s3331_s22 = sshll.u32 (!%p3718_p0), %s243_s7, 7 }
  0x5b   : > { %s3334_s23 = scalar_lea.vmem (!%p3718_p0), [#allocation2], %s3331_s22 }
  0x61   : > { %3121 = dma.done.wait (%p3719_p5), [#allocation4], 4096   ;;  %p3720_p6 = pmov %p3719_p5 }
  0x62   : > { %p3721_p10 = pmov %p3719_p5 }
  0x63   : > { %3123 = vsyncadd (%p3720_p6), [#allocation4], 4294963200 }
  0x64   : > { %3125 = dma.done.wait (%p3721_p10), [#allocation7], 512   ;;  %p3722_p11 = pmov %p3719_p5 }
  0x65   : > { %v3152_v16 = vmov 0.0   ;;  %v3153_v17 = vmov 0   ;;  %v279_v18 = vld [vmem:[%s3334_s23 + $0x8] sm:$0xff]  ;;  %v281_v20 = vld [vmem:[%s3334_s23 + $0x18] sm:$0xff]  ;;  %v278_v23 = vld [vmem:[%s3334_s23] sm:$0xff]  ;;  %vm322_vm0 = vcmask 261120  }
  0x66   : > { %3127 = vsyncadd (%p3722_p11), [#allocation7], 4294966784  ;;  %399 = vmatprep.mubr.f32.mxu0 %v3152_v16  ;;  %488 = vmatprep.mubr.f32.mxu1 %v3152_v16  ;;  %v283_v19 = vld [vmem:[%s3334_s23 + $0x28] sm:$0xff]  ;;  %v285_v22 = vld [vmem:[%s3334_s23 + $0x38] sm:$0xff]  ;;  %s3633_s30 = scalar_lea.vmem [#allocation8], %s3331_s22  ;;  %s2598_s22 = sshll.u32 %s3204_s19, 9 }
  0x67   : > { %2826 = vset.pattern.permute.xlu0 %v3153_v17  ;;  %2827 = vset.pattern.permute.xlu1 %v3153_v17  ;;  %v3349_v21 = vpack.c.bf16 %v283_v19, %v279_v18  ;;  %v282_v24 = vld [vmem:[%s3334_s23 + $0x20] sm:$0xff]  ;;  %v3354_v25 = vpack.c.bf16 %v285_v22, %v281_v20  ;;  %v280_v27 = vld [vmem:[%s3334_s23 + $0x10] sm:$0xff]  ;;  %v287_v29 = vld [vmem:[%s3334_s23 + $0x48] sm:$0xff]  ;;  %s2389_s20 = sshll.u32 %s3633_s30, 4  ;;  %s3652_s19 = scalar_lea.hbm %s3708_s4, %s2598_s22  ;;  %s3654_s20 = int_to_ptr.vmem [resolvable:$true] %s2389_s20 }
  0x68   : > { %v3356_v26 = vpack.c.bf16 %v282_v24, %v278_v23  ;;  %v284_v28 = vld [vmem:[%s3334_s23 + $0x30] sm:$0xff]  ;;  %v291_v31 = vld [vmem:[%s3334_s23 + $0x68] sm:$0xff]  ;;  %v289_v32 = vld [vmem:[%s3334_s23 + $0x58] sm:$0xff]  ;;  %s3662_s8 = scalar_lea.sflag [#allocation5], %s243_s7  ;;  %s3076_s9 = scalar_lea.vmem %s3654_s20, 2048 }
  0x69   : > { %2600 = vmatprep.subr.bf16.mxu0 %v3349_v21  ;;  %v3362_v30 = vpack.c.bf16 %v284_v28, %v280_v27  ;;  %v293_v33 = vld [vmem:[%s3334_s23 + $0x78] sm:$0xff]  ;;  %2608 = vmatprep.subr.bf16.mxu1 %v3354_v25  ;;  %v3369_v34 = vpack.c.bf16 %v291_v31, %v287_v29  ;;  %v286_v36 = vld [vmem:[%s3334_s23 + $0x40] sm:$0xff]  ;;  %v288_v38 = vld [vmem:[%s3334_s23 + $0x50] sm:$0xff]  ;;  %p3077_p12 = scmp.ne.s32.totalorder %s3654_s20, %s3076_s9  ;;  %p3723_p3 = scmp.ne.s32.totalorder %s3713_s26, 0 }
  0x6a   : > { %2602 = vmatpush1.bf16.msra.mxu0 %v3356_v26  ;;  %v3371_v35 = vpack.c.bf16 %v293_v33, %v289_v32  ;;  %v290_v37 = vld [vmem:[%s3334_s23 + $0x60] sm:$0xff]  ;;  %v292_v40 = vld [vmem:[%s3334_s23 + $0x70] sm:$0xff]  ;;  %v299_v45 = vld [vmem:[%s3707_s3 + $0x8] sm:$0xff]  ;;  %s3154_s10 = smov [#allocation8]  }
  0x6b   : > { %2610 = vmatpush1.bf16.msra.mxu1 %v3362_v30  ;;  %v3377_v39 = vpack.c.bf16 %v290_v37, %v286_v36  ;;  %2604 = vmatprep.subr.bf16.mxu0 %v3369_v34  ;;  %v3382_v41 = vpack.c.bf16 %v292_v40, %v288_v38  ;;  %v298_v42 = vld [vmem:[%s3707_s3] sm:$0xff]  ;;  %v300_v43 = vld [vmem:[%s3707_s3 + $0x10] sm:$0xff]  ;;  %v301_v46 = vld [vmem:[%s3707_s3 + $0x18] sm:$0xff]  ;;  %p3078_p4 = pnand %p3077_p12, %p3723_p3  ;;  %s3080_s5 = sshll.u32 %s3154_s10, 4  ;;  %s3081_s5 = int_to_ptr.vmem [resolvable:$false] %s3080_s5 }
  0x6c   : > { %2612 = vmatprep.subr.bf16.mxu1 %v3371_v35  ;;  %304 = vperm.xlu0 %2826, %v298_v42   ;;  %v294_v44 = vld [vmem:[#allocation3] sm:$0xff]  ;;  %v295_v47 = vld [vmem:[#allocation3 + $0x8] sm:$0xff]  ;;  %v296_v50 = vld [vmem:[#allocation3 + $0x10] sm:$0xff]  ;;  %s3082_s11 = scalar_lea.vmem %s3081_s5, 4096  ;;  %p3083_p8 = scmp.lt.s32.totalorder %s3654_s20, %s3081_s5 }
  0x6d   : > { %314 = vperm.xlu1 %2827, %v300_v43   ;;  %v2500_v48 = vld [vmem:[%s3707_s3 + $0x20] sm:$0xff]  ;;  %v2501_v49 = vld [vmem:[%s3707_s3 + $0x28] sm:$0xff]  ;;  %v2502_v51 = vld [vmem:[%s3707_s3 + $0x30] sm:$0xff]  ;;  %p3079_p7 = pneg %p3078_p4  ;;  %p3084_p9 = scmp.lt.s32.totalorder %s3082_s11, %s3076_s9 }
  0x6e   : > { %2606 = vmatpush1.bf16.msra.mxu0 %v3377_v39  ;;  %v2503_v52 = vld [vmem:[%s3707_s3 + $0x38] sm:$0xff]  ;;  %v2512_v54 = vld [vmem:[%s3707_s3 + $0x40] sm:$0xff]  ;;  %v2513_v55 = vld [vmem:[%s3707_s3 + $0x48] sm:$0xff] }
  0x6f   : > { %2614 = vmatpush1.bf16.msra.mxu1 %v3382_v41  ;;  %v297_v53 = vld [vmem:[#allocation3 + $0x18] sm:$0xff]  ;;  %v2514_v56 = vld [vmem:[%s3707_s3 + $0x50] sm:$0xff]  ;;  %v2524_v58 = vld [vmem:[%s3707_s3 + $0x60] sm:$0xff]  ;;  %p3085_p13 = por %p3084_p9, %p3083_p8 }
  0x70   : > { %309 = vperm.xlu0 %2826, %v299_v45   ;;  %v2515_v57 = vld [vmem:[%s3707_s3 + $0x58] sm:$0xff]  ;;  %v2525_v59 = vld [vmem:[%s3707_s3 + $0x68] sm:$0xff]  ;;  %v2526_v60 = vld [vmem:[%s3707_s3 + $0x70] sm:$0xff] }
  0x71   : > { %2492 = vmatmul.mubr.msk.f32.vlgmr.msra.gmra.mrb[0].mxu0 %vm322_vm0, %v294_v44  ;;  %319 = vperm.xlu1 %2827, %v301_v46   ;;  %v2527_v61 = vld [vmem:[%s3707_s3 + $0x78] sm:$0xff]  ;;  %v2552_v62 = vld [vmem:[%s3707_s3 + $0x80] sm:$0xff]  ;;  %v2553_v63 = vld [vmem:[%s3707_s3 + $0x88] sm:$0xff]  ;;  %p3086_p2 = pnand %p3085_p13, %p3079_p7 }
  0x72   : > { %2496 = vmatmul.mubr.msk.f32.vlgmr.msra.gmra.mrb[0].mxu1 %vm322_vm0, %v294_v44  ;;  %405 = vmatprep.mubr.f32.mxu0 %v3152_v16  ;;  %v2554_v0 = vld [vmem:[%s3707_s3 + $0x90] sm:$0xff]  ;;  %v2555_v1 = vld [vmem:[%s3707_s3 + $0x98] sm:$0xff]  ;;  %v2556_v2 = vld [vmem:[%s3707_s3 + $0xa0] sm:$0xff] }
  0x73   : > { %494 = vmatprep.mubr.f32.mxu1 %v3152_v16  ;;  %v2557_v3 = vld [vmem:[%s3707_s3 + $0xa8] sm:$0xff]  ;;  %v2558_v4 = vld [vmem:[%s3707_s3 + $0xb0] sm:$0xff]  ;;  %v2559_v5 = vld [vmem:[%s3707_s3 + $0xb8] sm:$0xff] }
  0x74   : > { %541 = vperm.xlu0 %2826, %v2500_v48   ;;  %v2568_v6 = vld [vmem:[%s3707_s3 + $0xc0] sm:$0xff]  ;;  %v2569_v7 = vld [vmem:[%s3707_s3 + $0xc8] sm:$0xff]  ;;  %v2570_v8 = vld [vmem:[%s3707_s3 + $0xd0] sm:$0xff] }
  0x75   : > { %2493 = vmatmul.mubr.msk.f32.gmra.mrb[2].mxu0 %vm322_vm0, %v295_v47  ;;  %546 = vperm.xlu1 %2827, %v2501_v49   ;;  %v2571_v9 = vld [vmem:[%s3707_s3 + $0xd8] sm:$0xff]  ;;  %v2580_v10 = vld [vmem:[%s3707_s3 + $0xe0] sm:$0xff]  ;;  %v2581_v11 = vld [vmem:[%s3707_s3 + $0xe8] sm:$0xff] }
  0x76   : > { %2497 = vmatmul.mubr.msk.f32.gmra.mrb[2].mxu1 %vm322_vm0, %v295_v47  ;;  %411 = vmatprep.mubr.f32.mxu0 %v3152_v16  ;;  %v2582_v12 = vld [vmem:[%s3707_s3 + $0xf0] sm:$0xff]  ;;  %v2583_v13 = vld [vmem:[%s3707_s3 + $0xf8] sm:$0xff] }
  0x77   : > { %500 = vmatprep.mubr.f32.mxu1 %v3152_v16 }
  0x78   : > { %551 = vperm.xlu0 %2826, %v2502_v51  }
  0x79   : > { %2494 = vmatmul.mubr.msk.f32.gmra.mrb[4].mxu0 %vm322_vm0, %v296_v50  ;;  %556 = vperm.xlu1 %2827, %v2503_v52  }
  0x7a   : > { %2498 = vmatmul.mubr.msk.f32.gmra.mrb[4].mxu1 %vm322_vm0, %v296_v50  ;;  %417 = vmatprep.mubr.f32.mxu0 %v3152_v16 }
  0x7b   : > { %506 = vmatprep.mubr.f32.mxu1 %v3152_v16 }
  0x7c   : > { %777 = vperm.xlu0 %2826, %v2512_v54  }
  0x7d   : > { %2495 = vmatmul.mubr.msk.f32.gmra.mrb[6].mxu0 %vm322_vm0, %v297_v53  ;;  %782 = vperm.xlu1 %2827, %v2513_v55  }
  0x7e   : > { %2499 = vmatmul.mubr.msk.f32.gmra.mrb[6].mxu1 %vm322_vm0, %v297_v53  ;;  %635 = vmatprep.mubr.f32.mxu0 %v3152_v16 }
  0x7f   : > { %724 = vmatprep.mubr.f32.mxu1 %v3152_v16 }
  0x80   : > { %787 = vperm.xlu0 %2826, %v2514_v56  }
  0x81   : > { %792 = vperm.xlu1 %2827, %v2515_v57  }
  0x84   : > { %1013 = vperm.xlu0 %2826, %v2524_v58  }
  0x85   : > { %1018 = vperm.xlu1 %2827, %v2525_v59  }
  0x88   : > { %1023 = vperm.xlu0 %2826, %v2526_v60  }
  0x89   : > { %1028 = vperm.xlu1 %2827, %v2527_v61  }
  0x8c   : > { %1617 = vperm.xlu0 %2826, %v2552_v62  }
  0x8d   : > { %1622 = vperm.xlu1 %2827, %v2553_v63  }
  0x90   : > { %1627 = vperm.xlu0 %2826, %v2554_v0  }
  0x91   : > { %1632 = vperm.xlu1 %2827, %v2555_v1  }
  0x94   : > { %1679 = vperm.xlu0 %2826, %v2556_v2  }
  0x95   : > { %1684 = vperm.xlu1 %2827, %v2557_v3  }
  0x98   : > { %1689 = vperm.xlu0 %2826, %v2558_v4  }
  0x99   : > { %1694 = vperm.xlu1 %2827, %v2559_v5  }
  0x9c   : > { %1915 = vperm.xlu0 %2826, %v2568_v6  }
  0x9d   : > { %1920 = vperm.xlu1 %2827, %v2569_v7  }
  0xa0   : > { %1925 = vperm.xlu0 %2826, %v2570_v8  }
  0xa1   : > { %1930 = vperm.xlu1 %2827, %v2571_v9  }
  0xa4   : > { %2151 = vperm.xlu0 %2826, %v2580_v10  }
  0xa5   : > { %2156 = vperm.xlu1 %2827, %v2581_v11  }
  0xa8   : > { %2161 = vperm.xlu0 %2826, %v2582_v12  }
  0xa9   : > { %2166 = vperm.xlu1 %2827, %v2583_v13  }
  0xeb   : > { %v305_v14 = vpop.permute.xlu0 %304 }
  0xec   : > { %v315_v33 = vpop.permute.xlu1 %314 }
  0xef   : > { %v310_v27 = vpop.permute.xlu0 %309 }
  0xf0   : > { %v320_v50 = vpop.permute.xlu1 %319 }
 0x144   : > { %v401_v15 = vpop.f32.mrb[0].mxu0 }
 0x145   : > { %v402_v17 = vadd.f32 %v401_v15, %v305_v14  ;;  %v490_v18 = vpop.f32.mrb[0].mxu1  ;;  %v403_v19 = vpop.f32.mrb[1].mxu0 }
 0x146   : > { %v491_v20 = vadd.f32 %v490_v18, %v305_v14  ;;  %v404_v22 = vadd.f32 %v403_v19, %v305_v14  ;;  %v492_v23 = vpop.f32.mrb[1].mxu1 }
 0x147   : > { %2828 = vtanh.f32 %v402_v17  ;;  %v493_v24 = vadd.f32 %v492_v23, %v305_v14  ;;  %v532_v23 = vld [vmem:[#allocation3 + $0x30] sm:$0xff] }
 0x148   : > { %2830 = vtanh.f32 %v491_v20  ;;  %v407_v28 = vpop.f32.mrb[2].mxu0  ;;  %v530_v20 = vld [vmem:[#allocation3 + $0x20] sm:$0xff] }
 0x149   : > { %2832 = vtanh.f32 %v404_v22  ;;  %v408_v29 = vadd.f32 %v407_v28, %v310_v27  ;;  %v496_v31 = vpop.f32.mrb[2].mxu1  ;;  %v409_v32 = vpop.f32.mrb[3].mxu0  ;;  %v531_v22 = vld [vmem:[#allocation3 + $0x28] sm:$0xff] }
 0x14a   : > { %2834 = vtanh.f32 %v493_v24  ;;  %v497_v36 = vadd.f32 %v496_v31, %v310_v27  ;;  %v410_v37 = vadd.f32 %v409_v32, %v310_v27  ;;  %v498_v38 = vpop.f32.mrb[3].mxu1  ;;  %v533_v24 = vld [vmem:[#allocation3 + $0x38] sm:$0xff] }
 0x14b   : > { %2836 = vtanh.f32 %v408_v29  ;;  %v499_v40 = vadd.f32 %v498_v38, %v310_v27  ;;  %v542_v27 = vpop.permute.xlu0 %541 }
 0x14c   : > { %2838 = vtanh.f32 %v497_v36  ;;  %v413_v42 = vpop.f32.mrb[4].mxu0 }
 0x14d   : > { %2840 = vtanh.f32 %v410_v37  ;;  %v414_v43 = vadd.f32 %v413_v42, %v315_v33  ;;  %v502_v44 = vpop.f32.mrb[4].mxu1  ;;  %v415_v45 = vpop.f32.mrb[5].mxu0 }
 0x14e   : > { %2842 = vtanh.f32 %v499_v40  ;;  %v503_v46 = vadd.f32 %v502_v44, %v315_v33  ;;  %v416_v47 = vadd.f32 %v415_v45, %v315_v33  ;;  %v504_v48 = vpop.f32.mrb[5].mxu1  ;;  %v547_v40 = vpop.permute.xlu1 %546 }
 0x14f   : > { %2844 = vtanh.f32 %v414_v43  ;;  %v505_v49 = vadd.f32 %v504_v48, %v315_v33 }
 0x150   : > { %2846 = vtanh.f32 %v503_v46  ;;  %v419_v51 = vpop.f32.mrb[6].mxu0 }
 0x151   : > { %v2829_v52 = vpop.eup %2828  ;;  %2848 = vtanh.f32 %v416_v47  ;;  %v420_v53 = vadd.f32 %v419_v51, %v320_v50  ;;  %v508_v54 = vpop.f32.mrb[6].mxu1 }
 0x152   : > { %v421_v55 = vpop.f32.mrb[7].mxu0  ;;  %v2831_v56 = vpop.eup %2830  ;;  %2850 = vtanh.f32 %v505_v49  ;;  %v509_v57 = vadd.f32 %v508_v54, %v320_v50 }
 0x153   : > { %v422_v58 = vadd.f32 %v421_v55, %v320_v50  ;;  %v510_v59 = vpop.f32.mrb[7].mxu1  ;;  %v2833_v60 = vpop.eup %2832  ;;  %2852 = vtanh.f32 %v420_v53 }
 0x154   : > { %v511_v61 = vadd.f32 %v510_v59, %v320_v50  ;;  %v2835_v62 = vpop.eup %2834  ;;  %2854 = vtanh.f32 %v509_v57  ;;  %v552_v50 = vpop.permute.xlu0 %551 }
 0x155   : > { %v2837_v63 = vpop.eup %2836  ;;  %2856 = vtanh.f32 %v422_v58  ;;  %v557_v59 = vpop.permute.xlu1 %556 }
 0x156   : > { %v2839_v0 = vpop.eup %2838  ;;  %2858 = vtanh.f32 %v511_v61  ;;  %v2617_v1 = vpack.c.bf16 %v2837_v63, %v2829_v52 }
 0x157   : > { %v2841_v2 = vpop.eup %2840  ;;  %v2625_v3 = vpack.c.bf16 %v2839_v0, %v2831_v56 }
 0x158   : > { %v2843_v4 = vpop.eup %2842  ;;  %v2615_v5 = vpack.c.bf16 %v2841_v2, %v2833_v60 }
 0x159   : > { %v2845_v6 = vpop.eup %2844  ;;  %v2623_v7 = vpack.c.bf16 %v2843_v4, %v2835_v62 }
 0x15a   : > { %v2847_v8 = vpop.eup %2846  ;;  %2616 = vmatprep.subr.bf16.mxu0 %v2615_v5 }
 0x15b   : > { %v2849_v9 = vpop.eup %2848  ;;  %2624 = vmatprep.subr.bf16.mxu1 %v2623_v7  ;;  %2618 = vmatpush1.bf16.msra.mxu0 %v2617_v1 }
 0x15c   : > { %v2851_v10 = vpop.eup %2850  ;;  %2626 = vmatpush1.bf16.msra.mxu1 %v2625_v3 }
 0x15d   : > { %v2853_v11 = vpop.eup %2852 }
 0x15e   : > { %v2855_v12 = vpop.eup %2854  ;;  %v2621_v13 = vpack.c.bf16 %v2853_v11, %v2845_v6 }
 0x15f   : > { %v2857_v14 = vpop.eup %2856  ;;  %v2629_v15 = vpack.c.bf16 %v2855_v12, %v2847_v8 }
 0x160   : > { %v2859_v17 = vpop.eup %2858  ;;  %v2619_v18 = vpack.c.bf16 %v2857_v14, %v2849_v9 }
 0x161   : > { %v2627_v19 = vpack.c.bf16 %v2859_v17, %v2851_v10 }
 0x162   : > { %2620 = vmatprep.subr.bf16.mxu0 %v2619_v18 }
 0x163   : > { %2628 = vmatprep.subr.bf16.mxu1 %v2627_v19  ;;  %2622 = vmatpush1.bf16.msra.mxu0 %v2621_v13 }
 0x164   : > { %2630 = vmatpush1.bf16.msra.mxu1 %v2629_v15 }
 0x166   : > { %2504 = vmatmul.mubr.msk.f32.vlgmr.msra.gmra.mrb[8].mxu0 %vm322_vm0, %v530_v20 }
 0x167   : > { %2508 = vmatmul.mubr.msk.f32.vlgmr.msra.gmra.mrb[8].mxu1 %vm322_vm0, %v530_v20  ;;  %641 = vmatprep.mubr.f32.mxu0 %v3152_v16 }
 0x168   : > { %730 = vmatprep.mubr.f32.mxu1 %v3152_v16 }
 0x16a   : > { %2505 = vmatmul.mubr.msk.f32.gmra.mrb[10].mxu0 %vm322_vm0, %v531_v22 }
 0x16b   : > { %2509 = vmatmul.mubr.msk.f32.gmra.mrb[10].mxu1 %vm322_vm0, %v531_v22  ;;  %647 = vmatprep.mubr.f32.mxu0 %v3152_v16 }
 0x16c   : > { %736 = vmatprep.mubr.f32.mxu1 %v3152_v16 }
 0x16e   : > { %2506 = vmatmul.mubr.msk.f32.gmra.mrb[12].mxu0 %vm322_vm0, %v532_v23 }
 0x16f   : > { %2510 = vmatmul.mubr.msk.f32.gmra.mrb[12].mxu1 %vm322_vm0, %v532_v23  ;;  %653 = vmatprep.mubr.f32.mxu0 %v3152_v16 }
 0x170   : > { %742 = vmatprep.mubr.f32.mxu1 %v3152_v16 }
 0x172   : > { %2507 = vmatmul.mubr.msk.f32.gmra.mrb[14].mxu0 %vm322_vm0, %v533_v24 }
 0x173   : > { %2511 = vmatmul.mubr.msk.f32.gmra.mrb[14].mxu1 %vm322_vm0, %v533_v24  ;;  %871 = vmatprep.mubr.f32.mxu0 %v3152_v16 }
 0x174   : > { %960 = vmatprep.mubr.f32.mxu1 %v3152_v16 }
 0x239   : > { %v637_v28 = vpop.f32.mrb[8].mxu0 }
 0x23a   : > { %v638_v29 = vadd.f32 %v637_v28, %v542_v27  ;;  %v726_v31 = vpop.f32.mrb[8].mxu1  ;;  %v639_v32 = vpop.f32.mrb[9].mxu0 }
 0x23b   : > { %v727_v33 = vadd.f32 %v726_v31, %v542_v27  ;;  %v640_v36 = vadd.f32 %v639_v32, %v542_v27  ;;  %v728_v37 = vpop.f32.mrb[9].mxu1 }
 0x23c   : > { %2860 = vtanh.f32 %v638_v29  ;;  %v729_v38 = vadd.f32 %v728_v37, %v542_v27  ;;  %v768_v37 = vld [vmem:[#allocation3 + $0x50] sm:$0xff] }
 0x23d   : > { %2862 = vtanh.f32 %v727_v33  ;;  %v643_v42 = vpop.f32.mrb[10].mxu0  ;;  %v766_v33 = vld [vmem:[#allocation3 + $0x40] sm:$0xff] }
 0x23e   : > { %2864 = vtanh.f32 %v640_v36  ;;  %v644_v43 = vadd.f32 %v643_v42, %v547_v40  ;;  %v732_v44 = vpop.f32.mrb[10].mxu1  ;;  %v645_v45 = vpop.f32.mrb[11].mxu0  ;;  %v767_v36 = vld [vmem:[#allocation3 + $0x48] sm:$0xff] }
 0x23f   : > { %2866 = vtanh.f32 %v729_v38  ;;  %v733_v46 = vadd.f32 %v732_v44, %v547_v40  ;;  %v646_v47 = vadd.f32 %v645_v45, %v547_v40  ;;  %v734_v48 = vpop.f32.mrb[11].mxu1  ;;  %v769_v38 = vld [vmem:[#allocation3 + $0x58] sm:$0xff] }
 0x240   : > { %2868 = vtanh.f32 %v644_v43  ;;  %v735_v49 = vadd.f32 %v734_v48, %v547_v40  ;;  %v778_v40 = vpop.permute.xlu0 %777 }
 0x241   : > { %2870 = vtanh.f32 %v733_v46  ;;  %v649_v51 = vpop.f32.mrb[12].mxu0 }
 0x242   : > { %2872 = vtanh.f32 %v646_v47  ;;  %v650_v52 = vadd.f32 %v649_v51, %v552_v50  ;;  %v738_v53 = vpop.f32.mrb[12].mxu1  ;;  %v651_v54 = vpop.f32.mrb[13].mxu0 }
 0x243   : > { %2874 = vtanh.f32 %v735_v49  ;;  %v739_v55 = vadd.f32 %v738_v53, %v552_v50  ;;  %v652_v56 = vadd.f32 %v651_v54, %v552_v50  ;;  %v740_v57 = vpop.f32.mrb[13].mxu1 }
 0x244   : > { %2876 = vtanh.f32 %v650_v52  ;;  %v741_v58 = vadd.f32 %v740_v57, %v552_v50  ;;  %v783_v50 = vpop.permute.xlu1 %782 }
 0x245   : > { %2878 = vtanh.f32 %v739_v55  ;;  %v655_v60 = vpop.f32.mrb[14].mxu0 }
 0x246   : > { %v2861_v61 = vpop.eup %2860  ;;  %2880 = vtanh.f32 %v652_v56  ;;  %v656_v62 = vadd.f32 %v655_v60, %v557_v59  ;;  %v744_v63 = vpop.f32.mrb[14].mxu1 }
 0x247   : > { %v657_v0 = vpop.f32.mrb[15].mxu0  ;;  %v2863_v1 = vpop.eup %2862  ;;  %2882 = vtanh.f32 %v741_v58  ;;  %v745_v2 = vadd.f32 %v744_v63, %v557_v59 }
 0x248   : > { %v658_v3 = vadd.f32 %v657_v0, %v557_v59  ;;  %v746_v4 = vpop.f32.mrb[15].mxu1  ;;  %v2865_v5 = vpop.eup %2864  ;;  %2884 = vtanh.f32 %v656_v62 }
 0x249   : > { %v747_v6 = vadd.f32 %v746_v4, %v557_v59  ;;  %v2867_v7 = vpop.eup %2866  ;;  %2886 = vtanh.f32 %v745_v2  ;;  %v788_v59 = vpop.permute.xlu0 %787 }
 0x24a   : > { %v2869_v8 = vpop.eup %2868  ;;  %2888 = vtanh.f32 %v658_v3  ;;  %v793_v4 = vpop.permute.xlu1 %792 }
 0x24b   : > { %v2871_v9 = vpop.eup %2870  ;;  %2890 = vtanh.f32 %v747_v6  ;;  %v2633_v10 = vpack.c.bf16 %v2869_v8, %v2861_v61 }
 0x24c   : > { %v2873_v11 = vpop.eup %2872  ;;  %v2641_v12 = vpack.c.bf16 %v2871_v9, %v2863_v1 }
 0x24d   : > { %v2875_v13 = vpop.eup %2874  ;;  %v2631_v14 = vpack.c.bf16 %v2873_v11, %v2865_v5 }
 0x24e   : > { %v2877_v15 = vpop.eup %2876  ;;  %v2639_v17 = vpack.c.bf16 %v2875_v13, %v2867_v7 }
 0x24f   : > { %v2879_v18 = vpop.eup %2878  ;;  %2632 = vmatprep.subr.bf16.mxu0 %v2631_v14 }
 0x250   : > { %v2881_v19 = vpop.eup %2880  ;;  %2640 = vmatprep.subr.bf16.mxu1 %v2639_v17  ;;  %2634 = vmatpush1.bf16.msra.mxu0 %v2633_v10 }
 0x251   : > { %v2883_v20 = vpop.eup %2882  ;;  %2642 = vmatpush1.bf16.msra.mxu1 %v2641_v12 }
 0x252   : > { %v2885_v22 = vpop.eup %2884 }
 0x253   : > { %v2887_v23 = vpop.eup %2886  ;;  %v2637_v24 = vpack.c.bf16 %v2885_v22, %v2877_v15 }
 0x254   : > { %v2889_v27 = vpop.eup %2888  ;;  %v2645_v28 = vpack.c.bf16 %v2887_v23, %v2879_v18 }
 0x255   : > { %v2891_v29 = vpop.eup %2890  ;;  %v2635_v31 = vpack.c.bf16 %v2889_v27, %v2881_v19 }
 0x256   : > { %v2643_v32 = vpack.c.bf16 %v2891_v29, %v2883_v20 }
 0x257   : > { %2636 = vmatprep.subr.bf16.mxu0 %v2635_v31 }
 0x258   : > { %2644 = vmatprep.subr.bf16.mxu1 %v2643_v32  ;;  %2638 = vmatpush1.bf16.msra.mxu0 %v2637_v24 }
 0x259   : > { %2646 = vmatpush1.bf16.msra.mxu1 %v2645_v28 }
 0x25b   : > { %2516 = vmatmul.mubr.msk.f32.vlgmr.msra.gmra.mrb[16].mxu0 %vm322_vm0, %v766_v33 }
 0x25c   : > { %2520 = vmatmul.mubr.msk.f32.vlgmr.msra.gmra.mrb[16].mxu1 %vm322_vm0, %v766_v33  ;;  %877 = vmatprep.mubr.f32.mxu0 %v3152_v16 }
 0x25d   : > { %966 = vmatprep.mubr.f32.mxu1 %v3152_v16 }
 0x25f   : > { %2517 = vmatmul.mubr.msk.f32.gmra.mrb[18].mxu0 %vm322_vm0, %v767_v36 }
 0x260   : > { %2521 = vmatmul.mubr.msk.f32.gmra.mrb[18].mxu1 %vm322_vm0, %v767_v36  ;;  %883 = vmatprep.mubr.f32.mxu0 %v3152_v16 }
 0x261   : > { %972 = vmatprep.mubr.f32.mxu1 %v3152_v16 }
 0x263   : > { %2518 = vmatmul.mubr.msk.f32.gmra.mrb[20].mxu0 %vm322_vm0, %v768_v37 }
 0x264   : > { %2522 = vmatmul.mubr.msk.f32.gmra.mrb[20].mxu1 %vm322_vm0, %v768_v37  ;;  %889 = vmatprep.mubr.f32.mxu0 %v3152_v16 }
 0x265   : > { %978 = vmatprep.mubr.f32.mxu1 %v3152_v16 }
 0x267   : > { %2519 = vmatmul.mubr.msk.f32.gmra.mrb[22].mxu0 %vm322_vm0, %v769_v38 }
 0x268   : > { %2523 = vmatmul.mubr.msk.f32.gmra.mrb[22].mxu1 %vm322_vm0, %v769_v38  ;;  %1107 = vmatprep.mubr.f32.mxu0 %v3152_v16 }
 0x269   : > { %1196 = vmatprep.mubr.f32.mxu1 %v3152_v16 }
 0x32e   : > { %v873_v42 = vpop.f32.mrb[16].mxu0 }
 0x32f   : > { %v874_v43 = vadd.f32 %v873_v42, %v778_v40  ;;  %v962_v44 = vpop.f32.mrb[16].mxu1  ;;  %v875_v45 = vpop.f32.mrb[17].mxu0 }
 0x330   : > { %v963_v46 = vadd.f32 %v962_v44, %v778_v40  ;;  %v876_v47 = vadd.f32 %v875_v45, %v778_v40  ;;  %v964_v48 = vpop.f32.mrb[17].mxu1 }
 0x331   : > { %2892 = vtanh.f32 %v874_v43  ;;  %v965_v49 = vadd.f32 %v964_v48, %v778_v40 }
 0x332   : > { %2894 = vtanh.f32 %v963_v46  ;;  %v879_v51 = vpop.f32.mrb[18].mxu0  ;;  %v1002_v46 = vld [vmem:[#allocation3 + $0x60] sm:$0xff] }
 0x333   : > { %2896 = vtanh.f32 %v876_v47  ;;  %v880_v52 = vadd.f32 %v879_v51, %v783_v50  ;;  %v968_v53 = vpop.f32.mrb[18].mxu1  ;;  %v881_v54 = vpop.f32.mrb[19].mxu0  ;;  %v1003_v47 = vld [vmem:[#allocation3 + $0x68] sm:$0xff] }
 0x334   : > { %2898 = vtanh.f32 %v965_v49  ;;  %v969_v55 = vadd.f32 %v968_v53, %v783_v50  ;;  %v882_v56 = vadd.f32 %v881_v54, %v783_v50  ;;  %v970_v57 = vpop.f32.mrb[19].mxu1  ;;  %v1019_v51 = vpop.permute.xlu1 %1018 }
 0x335   : > { %2900 = vtanh.f32 %v880_v52  ;;  %v971_v58 = vadd.f32 %v970_v57, %v783_v50  ;;  %v1014_v50 = vpop.permute.xlu0 %1013 }
 0x336   : > { %2902 = vtanh.f32 %v969_v55  ;;  %v885_v60 = vpop.f32.mrb[20].mxu0 }
 0x337   : > { %2904 = vtanh.f32 %v882_v56  ;;  %v886_v61 = vadd.f32 %v885_v60, %v788_v59  ;;  %v974_v62 = vpop.f32.mrb[20].mxu1  ;;  %v887_v63 = vpop.f32.mrb[21].mxu0 }
 0x338   : > { %2906 = vtanh.f32 %v971_v58  ;;  %v975_v0 = vadd.f32 %v974_v62, %v788_v59  ;;  %v888_v1 = vadd.f32 %v887_v63, %v788_v59  ;;  %v976_v2 = vpop.f32.mrb[21].mxu1 }
 0x339   : > { %2908 = vtanh.f32 %v886_v61  ;;  %v977_v3 = vadd.f32 %v976_v2, %v788_v59 }
 0x33a   : > { %2910 = vtanh.f32 %v975_v0  ;;  %v891_v5 = vpop.f32.mrb[22].mxu0 }
 0x33b   : > { %v2893_v6 = vpop.eup %2892  ;;  %2912 = vtanh.f32 %v888_v1  ;;  %v892_v7 = vadd.f32 %v891_v5, %v793_v4  ;;  %v980_v8 = vpop.f32.mrb[22].mxu1 }
 0x33c   : > { %v893_v9 = vpop.f32.mrb[23].mxu0  ;;  %v2895_v10 = vpop.eup %2894  ;;  %2914 = vtanh.f32 %v977_v3  ;;  %v981_v11 = vadd.f32 %v980_v8, %v793_v4 }
 0x33d   : > { %v894_v12 = vadd.f32 %v893_v9, %v793_v4  ;;  %v982_v13 = vpop.f32.mrb[23].mxu1  ;;  %v2897_v14 = vpop.eup %2896  ;;  %2916 = vtanh.f32 %v892_v7 }
 0x33e   : > { %v983_v15 = vadd.f32 %v982_v13, %v793_v4  ;;  %v2899_v17 = vpop.eup %2898  ;;  %2918 = vtanh.f32 %v981_v11  ;;  %v1024_v8 = vpop.permute.xlu0 %1023 }
 0x33f   : > { %v2901_v18 = vpop.eup %2900  ;;  %2920 = vtanh.f32 %v894_v12  ;;  %v1029_v9 = vpop.permute.xlu1 %1028 }
 0x340   : > { %v2903_v19 = vpop.eup %2902  ;;  %2922 = vtanh.f32 %v983_v15  ;;  %v2649_v20 = vpack.c.bf16 %v2901_v18, %v2893_v6 }
 0x341   : > { %v2905_v22 = vpop.eup %2904  ;;  %v2657_v23 = vpack.c.bf16 %v2903_v19, %v2895_v10 }
 0x342   : > { %v2907_v24 = vpop.eup %2906  ;;  %v2647_v27 = vpack.c.bf16 %v2905_v22, %v2897_v14 }
 0x343   : > { %v2909_v28 = vpop.eup %2908  ;;  %v2655_v29 = vpack.c.bf16 %v2907_v24, %v2899_v17 }
 0x344   : > { %v2911_v31 = vpop.eup %2910  ;;  %2648 = vmatprep.subr.bf16.mxu0 %v2647_v27 }
 0x345   : > { %v2913_v32 = vpop.eup %2912  ;;  %2656 = vmatprep.subr.bf16.mxu1 %v2655_v29  ;;  %2650 = vmatpush1.bf16.msra.mxu0 %v2649_v20 }
 0x346   : > { %v2915_v33 = vpop.eup %2914  ;;  %2658 = vmatpush1.bf16.msra.mxu1 %v2657_v23 }
 0x347   : > { %v2917_v36 = vpop.eup %2916 }
 0x348   : > { %v2919_v37 = vpop.eup %2918  ;;  %v2653_v38 = vpack.c.bf16 %v2917_v36, %v2909_v28  ;;  %v1225_v36 = vld [vmem:[#allocation3 + $0x98] sm:$0xff] }
 0x349   : > { %v2921_v40 = vpop.eup %2920  ;;  %v2661_v42 = vpack.c.bf16 %v2919_v37, %v2911_v31  ;;  %v1222_v31 = vld [vmem:[#allocation3 + $0x80] sm:$0xff]  ;;  %v1618_v37 = vpop.permute.xlu0 %1617 }
 0x34a   : > { %v2923_v43 = vpop.eup %2922  ;;  %v2651_v44 = vpack.c.bf16 %v2921_v40, %v2913_v32  ;;  %v1223_v32 = vld [vmem:[#allocation3 + $0x88] sm:$0xff] }
 0x34b   : > { %v2659_v45 = vpack.c.bf16 %v2923_v43, %v2915_v33  ;;  %v1224_v33 = vld [vmem:[#allocation3 + $0x90] sm:$0xff] }
 0x34c   : > { %2652 = vmatprep.subr.bf16.mxu0 %v2651_v44 }
 0x34d   : > { %2660 = vmatprep.subr.bf16.mxu1 %v2659_v45  ;;  %2654 = vmatpush1.bf16.msra.mxu0 %v2653_v38 }
 0x34e   : > { %2662 = vmatpush1.bf16.msra.mxu1 %v2661_v42  ;;  %2664 = vmatprep.subr.bf16.mxu0 %v3349_v21  ;;  %v1004_v21 = vld [vmem:[#allocation3 + $0x70] sm:$0xff] }
 0x34f   : > { %2672 = vmatprep.subr.bf16.mxu1 %v3354_v25  ;;  %v1005_v25 = vld [vmem:[#allocation3 + $0x78] sm:$0xff] }
 0x350   : > { %2528 = vmatmul.mubr.msk.f32.vlgmr.msra.gmra.mrb[24].mxu0 %vm322_vm0, %v1002_v46 }
 0x351   : > { %2532 = vmatmul.mubr.msk.f32.vlgmr.msra.gmra.mrb[24].mxu1 %vm322_vm0, %v1002_v46  ;;  %1113 = vmatprep.mubr.f32.mxu0 %v3152_v16 }
 0x352   : > { %1202 = vmatprep.mubr.f32.mxu1 %v3152_v16  ;;  %2666 = vmatpush1.bf16.msra.mxu0 %v3356_v26  ;;  %v1226_v26 = vld [vmem:[#allocation6] sm:$0xff] }
 0x353   : > { %2674 = vmatpush1.bf16.msra.mxu1 %v3362_v30  ;;  %2668 = vmatprep.subr.bf16.mxu0 %v3369_v34  ;;  %v1227_v30 = vld [vmem:[#allocation6 + $0x8] sm:$0xff]  ;;  %v1228_v34 = vld [vmem:[#allocation6 + $0x10] sm:$0xff] }
 0x354   : > { %2529 = vmatmul.mubr.msk.f32.gmra.mrb[26].mxu0 %vm322_vm0, %v1003_v47  ;;  %2676 = vmatprep.subr.bf16.mxu1 %v3371_v35  ;;  %v1229_v35 = vld [vmem:[#allocation6 + $0x18] sm:$0xff] }
 0x355   : > { %2533 = vmatmul.mubr.msk.f32.gmra.mrb[26].mxu1 %vm322_vm0, %v1003_v47  ;;  %1119 = vmatprep.mubr.f32.mxu0 %v3152_v16 }
 0x356   : > { %1208 = vmatprep.mubr.f32.mxu1 %v3152_v16  ;;  %2670 = vmatpush1.bf16.msra.mxu0 %v3377_v39 }
 0x357   : > { %2678 = vmatpush1.bf16.msra.mxu1 %v3382_v41 }
 0x358   : > { %2530 = vmatmul.mubr.msk.f32.gmra.mrb[28].mxu0 %vm322_vm0, %v1004_v21 }
 0x359   : > { %2534 = vmatmul.mubr.msk.f32.gmra.mrb[28].mxu1 %vm322_vm0, %v1004_v21  ;;  %1125 = vmatprep.mubr.f32.mxu0 %v3152_v16  ;;  %v1623_v21 = vpop.permute.xlu1 %1622 }
 0x35a   : > { %1214 = vmatprep.mubr.f32.mxu1 %v3152_v16 }
 0x35c   : > { %2531 = vmatmul.mubr.msk.f32.gmra.mrb[30].mxu0 %vm322_vm0, %v1005_v25 }
 0x35d   : > { %2535 = vmatmul.mubr.msk.f32.gmra.mrb[30].mxu1 %vm322_vm0, %v1005_v25  ;;  %1306 = vmatprep.mubr.f32.mxu0 %v3152_v16 }
 0x35e   : > { %1395 = vmatprep.mubr.f32.mxu1 %v3152_v16 }
 0x360   : > { %2536 = vmatmul.mubr.msk.f32.vlgmr.msra.gmra.mrb[32].mxu0 %vm322_vm0, %v1226_v26 }
 0x361   : > { %2540 = vmatmul.mubr.msk.f32.vlgmr.msra.gmra.mrb[32].mxu1 %vm322_vm0, %v1226_v26  ;;  %1312 = vmatprep.mubr.f32.mxu0 %v3152_v16 }
 0x362   : > { %1401 = vmatprep.mubr.f32.mxu1 %v3152_v16 }
 0x364   : > { %2537 = vmatmul.mubr.msk.f32.gmra.mrb[34].mxu0 %vm322_vm0, %v1227_v30 }
 0x365   : > { %2541 = vmatmul.mubr.msk.f32.gmra.mrb[34].mxu1 %vm322_vm0, %v1227_v30  ;;  %1318 = vmatprep.mubr.f32.mxu0 %v3152_v16 }
 0x366   : > { %1407 = vmatprep.mubr.f32.mxu1 %v3152_v16 }
 0x368   : > { %2538 = vmatmul.mubr.msk.f32.gmra.mrb[36].mxu0 %vm322_vm0, %v1228_v34 }
 0x369   : > { %2542 = vmatmul.mubr.msk.f32.gmra.mrb[36].mxu1 %vm322_vm0, %v1228_v34  ;;  %1324 = vmatprep.mubr.f32.mxu0 %v3152_v16 }
 0x36a   : > { %1413 = vmatprep.mubr.f32.mxu1 %v3152_v16 }
 0x36c   : > { %2539 = vmatmul.mubr.msk.f32.gmra.mrb[38].mxu0 %vm322_vm0, %v1229_v35 }
 0x36d   : > { %2543 = vmatmul.mubr.msk.f32.gmra.mrb[38].mxu1 %vm322_vm0, %v1229_v35  ;;  %1496 = vmatprep.mubr.f32.mxu0 %v3152_v16 }
 0x36e   : > { %1585 = vmatprep.mubr.f32.mxu1 %v3152_v16 }
 0x423   : > { %v1109_v39 = vpop.f32.mrb[24].mxu0 }
 0x424   : > { %v1198_v41 = vpop.f32.mrb[24].mxu1  ;;  %v1111_v48 = vpop.f32.mrb[25].mxu0  ;;  %v1110_v53 = vadd.f32 %v1109_v39, %v1014_v50 }
 0x425   : > { %v1200_v49 = vpop.f32.mrb[25].mxu1  ;;  %v1199_v57 = vadd.f32 %v1198_v41, %v1014_v50  ;;  %v1112_v58 = vadd.f32 %v1111_v48, %v1014_v50 }
 0x426   : > { %v1201_v62 = vadd.f32 %v1200_v49, %v1014_v50  ;;  %v1628_v49 = vpop.permute.xlu0 %1627 }
 0x427   : > { %v1115_v52 = vpop.f32.mrb[26].mxu0 }
 0x428   : > { %v1116_v54 = vadd.f32 %v1115_v52, %v1019_v51  ;;  %v1204_v55 = vpop.f32.mrb[26].mxu1  ;;  %v1117_v56 = vpop.f32.mrb[27].mxu0 }
 0x429   : > { %v1205_v59 = vadd.f32 %v1204_v55, %v1019_v51  ;;  %v1118_v60 = vadd.f32 %v1117_v56, %v1019_v51  ;;  %v1206_v61 = vpop.f32.mrb[27].mxu1 }
 0x42a   : > { %v2681_v63 = vpack.c.bf16 %v1116_v54, %v1110_v53  ;;  %v1207_v0 = vadd.f32 %v1206_v61, %v1019_v51 }
 0x42b   : > { %v2689_v1 = vpack.c.bf16 %v1205_v59, %v1199_v57  ;;  %v2679_v2 = vpack.c.bf16 %v1118_v60, %v1112_v58  ;;  %v1121_v3 = vpop.f32.mrb[28].mxu0  ;;  %v1633_v58 = vpop.permute.xlu1 %1632 }
 0x42c   : > { %v2687_v4 = vpack.c.bf16 %v1207_v0, %v1201_v62  ;;  %v1210_v5 = vpop.f32.mrb[28].mxu1  ;;  %v1123_v6 = vpop.f32.mrb[29].mxu0  ;;  %v1122_v11 = vadd.f32 %v1121_v3, %v1024_v8 }
 0x42d   : > { %v1212_v7 = vpop.f32.mrb[29].mxu1  ;;  %2680 = vmatprep.subr.bf16.mxu0 %v2679_v2  ;;  %v1211_v15 = vadd.f32 %v1210_v5, %v1024_v8  ;;  %v1124_v17 = vadd.f32 %v1123_v6, %v1024_v8 }
 0x42e   : > { %2688 = vmatprep.subr.bf16.mxu1 %v2687_v4  ;;  %2682 = vmatpush1.bf16.msra.mxu0 %v2681_v63  ;;  %v1213_v22 = vadd.f32 %v1212_v7, %v1024_v8 }
 0x42f   : > { %2690 = vmatpush1.bf16.msra.mxu1 %v2689_v1  ;;  %v1127_v10 = vpop.f32.mrb[30].mxu0 }
 0x430   : > { %v1128_v12 = vadd.f32 %v1127_v10, %v1029_v9  ;;  %v1216_v13 = vpop.f32.mrb[30].mxu1  ;;  %v1129_v14 = vpop.f32.mrb[31].mxu0 }
 0x431   : > { %v1217_v18 = vadd.f32 %v1216_v13, %v1029_v9  ;;  %v1130_v19 = vadd.f32 %v1129_v14, %v1029_v9  ;;  %v1218_v20 = vpop.f32.mrb[31].mxu1 }
 0x432   : > { %v2685_v23 = vpack.c.bf16 %v1128_v12, %v1122_v11  ;;  %v1219_v24 = vadd.f32 %v1218_v20, %v1029_v9 }
 0x433   : > { %v2693_v27 = vpack.c.bf16 %v1217_v18, %v1211_v15  ;;  %v2683_v28 = vpack.c.bf16 %v1130_v19, %v1124_v17 }
 0x434   : > { %v2691_v29 = vpack.c.bf16 %v1219_v24, %v1213_v22 }
 0x435   : > { %2684 = vmatprep.subr.bf16.mxu0 %v2683_v28 }
 0x436   : > { %2692 = vmatprep.subr.bf16.mxu1 %v2691_v29  ;;  %2686 = vmatpush1.bf16.msra.mxu0 %v2685_v23 }
 0x437   : > { %2694 = vmatpush1.bf16.msra.mxu1 %v2693_v27 }
 0x439   : > { %2544 = vmatmul.mubr.msk.f32.vlgmr.msra.gmra.mrb[32].mxu0 %vm322_vm0, %v1222_v31 }
 0x43a   : > { %2548 = vmatmul.mubr.msk.f32.vlgmr.msra.gmra.mrb[32].mxu1 %vm322_vm0, %v1222_v31  ;;  %1502 = vmatprep.mubr.f32.mxu0 %v3152_v16 }
 0x43b   : > { %1591 = vmatprep.mubr.f32.mxu1 %v3152_v16 }
 0x43d   : > { %2545 = vmatmul.mubr.msk.f32.gmra.mrb[34].mxu0 %vm322_vm0, %v1223_v32 }
 0x43e   : > { %2549 = vmatmul.mubr.msk.f32.gmra.mrb[34].mxu1 %vm322_vm0, %v1223_v32  ;;  %1508 = vmatprep.mubr.f32.mxu0 %v3152_v16  ;;  %v1668_v32 = vld [vmem:[#allocation3 + $0xa0] sm:$0xff] }
 0x43f   : > { %1597 = vmatprep.mubr.f32.mxu1 %v3152_v16 }
 0x441   : > { %2546 = vmatmul.mubr.msk.f32.gmra.mrb[36].mxu0 %vm322_vm0, %v1224_v33 }
 0x442   : > { %2550 = vmatmul.mubr.msk.f32.gmra.mrb[36].mxu1 %vm322_vm0, %v1224_v33  ;;  %1514 = vmatprep.mubr.f32.mxu0 %v3152_v16  ;;  %v1669_v33 = vld [vmem:[#allocation3 + $0xa8] sm:$0xff] }
 0x443   : > { %1603 = vmatprep.mubr.f32.mxu1 %v3152_v16 }
 0x445   : > { %2547 = vmatmul.mubr.msk.f32.gmra.mrb[38].mxu0 %vm322_vm0, %v1225_v36 }
 0x446   : > { %2551 = vmatmul.mubr.msk.f32.gmra.mrb[38].mxu1 %vm322_vm0, %v1225_v36  ;;  %1773 = vmatprep.mubr.f32.mxu0 %v3152_v16  ;;  %v1670_v36 = vld [vmem:[#allocation3 + $0xb0] sm:$0xff] }
 0x447   : > { %1862 = vmatprep.mubr.f32.mxu1 %v3152_v16 }
 0x50c   : > { %v1498_v38 = vpop.f32.mrb[32].mxu0 }
 0x50d   : > { %v1635_v40 = vadd.f32 %v1618_v37, %v1498_v38  ;;  %v1587_v42 = vpop.f32.mrb[32].mxu1  ;;  %v1500_v43 = vpop.f32.mrb[33].mxu0 }
 0x50e   : > { %v1637_v44 = vadd.f32 %v1618_v37, %v1587_v42  ;;  %v1636_v45 = vadd.f32 %v1618_v37, %v1500_v43  ;;  %v1589_v46 = vpop.f32.mrb[33].mxu1  ;;  %v1680_v38 = vpop.permute.xlu0 %1679 }
 0x50f   : > { %2924 = vtanh.f32 %v1635_v40  ;;  %v1638_v47 = vadd.f32 %v1618_v37, %v1589_v46  ;;  %v1671_v37 = vld [vmem:[#allocation3 + $0xb8] sm:$0xff] }
 0x510   : > { %2926 = vtanh.f32 %v1637_v44  ;;  %v1504_v25 = vpop.f32.mrb[34].mxu0 }
 0x511   : > { %2928 = vtanh.f32 %v1636_v45  ;;  %v1639_v26 = vadd.f32 %v1623_v21, %v1504_v25  ;;  %v1593_v30 = vpop.f32.mrb[34].mxu1  ;;  %v1506_v34 = vpop.f32.mrb[35].mxu0 }
 0x512   : > { %2930 = vtanh.f32 %v1638_v47  ;;  %v1641_v35 = vadd.f32 %v1623_v21, %v1593_v30  ;;  %v1640_v39 = vadd.f32 %v1623_v21, %v1506_v34  ;;  %v1595_v41 = vpop.f32.mrb[35].mxu1  ;;  %v1685_v25 = vpop.permute.xlu1 %1684 }
 0x513   : > { %2932 = vtanh.f32 %v1639_v26  ;;  %v1642_v48 = vadd.f32 %v1623_v21, %v1595_v41 }
 0x514   : > { %2934 = vtanh.f32 %v1641_v35  ;;  %v1510_v50 = vpop.f32.mrb[36].mxu0 }
 0x515   : > { %2936 = vtanh.f32 %v1640_v39  ;;  %v1643_v51 = vadd.f32 %v1628_v49, %v1510_v50  ;;  %v1599_v52 = vpop.f32.mrb[36].mxu1  ;;  %v1512_v53 = vpop.f32.mrb[37].mxu0 }
 0x516   : > { %2938 = vtanh.f32 %v1642_v48  ;;  %v1645_v54 = vadd.f32 %v1628_v49, %v1599_v52  ;;  %v1644_v55 = vadd.f32 %v1628_v49, %v1512_v53  ;;  %v1601_v56 = vpop.f32.mrb[37].mxu1  ;;  %v1690_v50 = vpop.permute.xlu0 %1689 }
 0x517   : > { %2940 = vtanh.f32 %v1643_v51  ;;  %v1646_v57 = vadd.f32 %v1628_v49, %v1601_v56 }
 0x518   : > { %2942 = vtanh.f32 %v1645_v54  ;;  %v1516_v59 = vpop.f32.mrb[38].mxu0 }
 0x519   : > { %v2925_v60 = vpop.eup %2924  ;;  %2944 = vtanh.f32 %v1644_v55  ;;  %v1647_v61 = vadd.f32 %v1633_v58, %v1516_v59  ;;  %v1605_v62 = vpop.f32.mrb[38].mxu1 }
 0x51a   : > { %v1518_v63 = vpop.f32.mrb[39].mxu0  ;;  %v2927_v0 = vpop.eup %2926  ;;  %2946 = vtanh.f32 %v1646_v57  ;;  %v1649_v1 = vadd.f32 %v1633_v58, %v1605_v62 }
 0x51b   : > { %v1648_v2 = vadd.f32 %v1633_v58, %v1518_v63  ;;  %v1607_v3 = vpop.f32.mrb[39].mxu1  ;;  %v2929_v4 = vpop.eup %2928  ;;  %2948 = vtanh.f32 %v1647_v61 }
 0x51c   : > { %v1650_v5 = vadd.f32 %v1633_v58, %v1607_v3  ;;  %v2931_v6 = vpop.eup %2930  ;;  %2950 = vtanh.f32 %v1649_v1  ;;  %v1695_v59 = vpop.permute.xlu1 %1694 }
 0x51d   : > { %v2933_v7 = vpop.eup %2932  ;;  %2952 = vtanh.f32 %v1648_v2 }
 0x51e   : > { %v2935_v8 = vpop.eup %2934  ;;  %2954 = vtanh.f32 %v1650_v5  ;;  %v2697_v9 = vpack.c.bf16 %v2933_v7, %v2925_v60 }
 0x51f   : > { %v2937_v10 = vpop.eup %2936  ;;  %v2705_v11 = vpack.c.bf16 %v2935_v8, %v2927_v0 }
 0x520   : > { %v2939_v12 = vpop.eup %2938  ;;  %v2695_v13 = vpack.c.bf16 %v2937_v10, %v2929_v4 }
 0x521   : > { %v2941_v14 = vpop.eup %2940  ;;  %v2703_v15 = vpack.c.bf16 %v2939_v12, %v2931_v6 }
 0x522   : > { %v2943_v17 = vpop.eup %2942  ;;  %2696 = vmatprep.subr.bf16.mxu0 %v2695_v13 }
 0x523   : > { %v2945_v18 = vpop.eup %2944  ;;  %2704 = vmatprep.subr.bf16.mxu1 %v2703_v15  ;;  %2698 = vmatpush1.bf16.msra.mxu0 %v2697_v9 }
 0x524   : > { %v2947_v19 = vpop.eup %2946  ;;  %2706 = vmatpush1.bf16.msra.mxu1 %v2705_v11 }
 0x525   : > { %v2949_v20 = vpop.eup %2948 }
 0x526   : > { %v2951_v22 = vpop.eup %2950  ;;  %v2701_v23 = vpack.c.bf16 %v2949_v20, %v2941_v14 }
 0x527   : > { %v2953_v24 = vpop.eup %2952  ;;  %v2709_v27 = vpack.c.bf16 %v2951_v22, %v2943_v17 }
 0x528   : > { %v2955_v28 = vpop.eup %2954  ;;  %v2699_v29 = vpack.c.bf16 %v2953_v24, %v2945_v18 }
 0x529   : > { %v2707_v31 = vpack.c.bf16 %v2955_v28, %v2947_v19 }
 0x52a   : > { %2700 = vmatprep.subr.bf16.mxu0 %v2699_v29 }
 0x52b   : > { %2708 = vmatprep.subr.bf16.mxu1 %v2707_v31  ;;  %2702 = vmatpush1.bf16.msra.mxu0 %v2701_v23 }
 0x52c   : > { %2710 = vmatpush1.bf16.msra.mxu1 %v2709_v27 }
 0x52e   : > { %2560 = vmatmul.mubr.msk.f32.vlgmr.msra.gmra.mrb[40].mxu0 %vm322_vm0, %v1668_v32 }
 0x52f   : > { %2564 = vmatmul.mubr.msk.f32.vlgmr.msra.gmra.mrb[40].mxu1 %vm322_vm0, %v1668_v32  ;;  %1779 = vmatprep.mubr.f32.mxu0 %v3152_v16 }
 0x530   : > { %1868 = vmatprep.mubr.f32.mxu1 %v3152_v16 }
 0x532   : > { %2561 = vmatmul.mubr.msk.f32.gmra.mrb[42].mxu0 %vm322_vm0, %v1669_v33 }
 0x533   : > { %2565 = vmatmul.mubr.msk.f32.gmra.mrb[42].mxu1 %vm322_vm0, %v1669_v33  ;;  %1785 = vmatprep.mubr.f32.mxu0 %v3152_v16  ;;  %v1904_v33 = vld [vmem:[#allocation3 + $0xc0] sm:$0xff] }
 0x534   : > { %1874 = vmatprep.mubr.f32.mxu1 %v3152_v16 }
 0x536   : > { %2562 = vmatmul.mubr.msk.f32.gmra.mrb[44].mxu0 %vm322_vm0, %v1670_v36 }
 0x537   : > { %2566 = vmatmul.mubr.msk.f32.gmra.mrb[44].mxu1 %vm322_vm0, %v1670_v36  ;;  %1791 = vmatprep.mubr.f32.mxu0 %v3152_v16  ;;  %v1905_v36 = vld [vmem:[#allocation3 + $0xc8] sm:$0xff] }
 0x538   : > { %1880 = vmatprep.mubr.f32.mxu1 %v3152_v16 }
 0x53a   : > { %2563 = vmatmul.mubr.msk.f32.gmra.mrb[46].mxu0 %vm322_vm0, %v1671_v37 }
 0x53b   : > { %2567 = vmatmul.mubr.msk.f32.gmra.mrb[46].mxu1 %vm322_vm0, %v1671_v37  ;;  %2009 = vmatprep.mubr.f32.mxu0 %v3152_v16  ;;  %v1906_v37 = vld [vmem:[#allocation3 + $0xd0] sm:$0xff] }
 0x53c   : > { %2098 = vmatprep.mubr.f32.mxu1 %v3152_v16 }
 0x601   : > { %v1775_v40 = vpop.f32.mrb[40].mxu0 }
 0x602   : > { %v1776_v42 = vadd.f32 %v1775_v40, %v1680_v38  ;;  %v1864_v43 = vpop.f32.mrb[40].mxu1  ;;  %v1777_v44 = vpop.f32.mrb[41].mxu0 }
 0x603   : > { %v1865_v45 = vadd.f32 %v1864_v43, %v1680_v38  ;;  %v1778_v46 = vadd.f32 %v1777_v44, %v1680_v38  ;;  %v1866_v47 = vpop.f32.mrb[41].mxu1  ;;  %v1916_v40 = vpop.permute.xlu0 %1915 }
 0x604   : > { %2956 = vtanh.f32 %v1776_v42  ;;  %v1867_v21 = vadd.f32 %v1866_v47, %v1680_v38  ;;  %v1907_v38 = vld [vmem:[#allocation3 + $0xd8] sm:$0xff] }
 0x605   : > { %2958 = vtanh.f32 %v1865_v45  ;;  %v1781_v26 = vpop.f32.mrb[42].mxu0 }
 0x606   : > { %2960 = vtanh.f32 %v1778_v46  ;;  %v1782_v30 = vadd.f32 %v1781_v26, %v1685_v25  ;;  %v1870_v34 = vpop.f32.mrb[42].mxu1  ;;  %v1783_v35 = vpop.f32.mrb[43].mxu0 }
 0x607   : > { %2962 = vtanh.f32 %v1867_v21  ;;  %v1871_v39 = vadd.f32 %v1870_v34, %v1685_v25  ;;  %v1784_v41 = vadd.f32 %v1783_v35, %v1685_v25  ;;  %v1872_v48 = vpop.f32.mrb[43].mxu1  ;;  %v1921_v26 = vpop.permute.xlu1 %1920 }
 0x608   : > { %2964 = vtanh.f32 %v1782_v30  ;;  %v1873_v49 = vadd.f32 %v1872_v48, %v1685_v25 }
 0x609   : > { %2966 = vtanh.f32 %v1871_v39  ;;  %v1787_v51 = vpop.f32.mrb[44].mxu0 }
 0x60a   : > { %2968 = vtanh.f32 %v1784_v41  ;;  %v1788_v52 = vadd.f32 %v1787_v51, %v1690_v50  ;;  %v1876_v53 = vpop.f32.mrb[44].mxu1  ;;  %v1789_v54 = vpop.f32.mrb[45].mxu0 }
 0x60b   : > { %2970 = vtanh.f32 %v1873_v49  ;;  %v1877_v55 = vadd.f32 %v1876_v53, %v1690_v50  ;;  %v1790_v56 = vadd.f32 %v1789_v54, %v1690_v50  ;;  %v1878_v57 = vpop.f32.mrb[45].mxu1  ;;  %v1926_v51 = vpop.permute.xlu0 %1925 }
 0x60c   : > { %2972 = vtanh.f32 %v1788_v52  ;;  %v1879_v58 = vadd.f32 %v1878_v57, %v1690_v50 }
 0x60d   : > { %2974 = vtanh.f32 %v1877_v55  ;;  %v1793_v60 = vpop.f32.mrb[46].mxu0 }
 0x60e   : > { %v2957_v61 = vpop.eup %2956  ;;  %2976 = vtanh.f32 %v1790_v56  ;;  %v1794_v62 = vadd.f32 %v1793_v60, %v1695_v59  ;;  %v1882_v63 = vpop.f32.mrb[46].mxu1 }
 0x60f   : > { %v1795_v0 = vpop.f32.mrb[47].mxu0  ;;  %v2959_v1 = vpop.eup %2958  ;;  %2978 = vtanh.f32 %v1879_v58  ;;  %v1883_v2 = vadd.f32 %v1882_v63, %v1695_v59 }
 0x610   : > { %v1796_v3 = vadd.f32 %v1795_v0, %v1695_v59  ;;  %v1884_v4 = vpop.f32.mrb[47].mxu1  ;;  %v2961_v5 = vpop.eup %2960  ;;  %2980 = vtanh.f32 %v1794_v62 }
 0x611   : > { %v1885_v6 = vadd.f32 %v1884_v4, %v1695_v59  ;;  %v2963_v7 = vpop.eup %2962  ;;  %2982 = vtanh.f32 %v1883_v2  ;;  %v1931_v60 = vpop.permute.xlu1 %1930 }
 0x612   : > { %v2965_v8 = vpop.eup %2964  ;;  %2984 = vtanh.f32 %v1796_v3 }
 0x613   : > { %v2967_v9 = vpop.eup %2966  ;;  %2986 = vtanh.f32 %v1885_v6  ;;  %v2713_v10 = vpack.c.bf16 %v2965_v8, %v2957_v61 }
 0x614   : > { %v2969_v11 = vpop.eup %2968  ;;  %v2721_v12 = vpack.c.bf16 %v2967_v9, %v2959_v1 }
 0x615   : > { %v2971_v13 = vpop.eup %2970  ;;  %v2711_v14 = vpack.c.bf16 %v2969_v11, %v2961_v5 }
 0x616   : > { %v2973_v15 = vpop.eup %2972  ;;  %v2719_v17 = vpack.c.bf16 %v2971_v13, %v2963_v7 }
 0x617   : > { %v2975_v18 = vpop.eup %2974  ;;  %2712 = vmatprep.subr.bf16.mxu0 %v2711_v14 }
 0x618   : > { %v2977_v19 = vpop.eup %2976  ;;  %2720 = vmatprep.subr.bf16.mxu1 %v2719_v17  ;;  %2714 = vmatpush1.bf16.msra.mxu0 %v2713_v10 }
 0x619   : > { %v2979_v20 = vpop.eup %2978  ;;  %2722 = vmatpush1.bf16.msra.mxu1 %v2721_v12 }
 0x61a   : > { %v2981_v22 = vpop.eup %2980 }
 0x61b   : > { %v2983_v23 = vpop.eup %2982  ;;  %v2717_v24 = vpack.c.bf16 %v2981_v22, %v2973_v15 }
 0x61c   : > { %v2985_v27 = vpop.eup %2984  ;;  %v2725_v28 = vpack.c.bf16 %v2983_v23, %v2975_v18 }
 0x61d   : > { %v2987_v29 = vpop.eup %2986  ;;  %v2715_v31 = vpack.c.bf16 %v2985_v27, %v2977_v19 }
 0x61e   : > { %v2723_v32 = vpack.c.bf16 %v2987_v29, %v2979_v20 }
 0x61f   : > { %2716 = vmatprep.subr.bf16.mxu0 %v2715_v31 }
 0x620   : > { %2724 = vmatprep.subr.bf16.mxu1 %v2723_v32  ;;  %2718 = vmatpush1.bf16.msra.mxu0 %v2717_v24 }
 0x621   : > { %2726 = vmatpush1.bf16.msra.mxu1 %v2725_v28 }
 0x623   : > { %2572 = vmatmul.mubr.msk.f32.vlgmr.msra.gmra.mrb[48].mxu0 %vm322_vm0, %v1904_v33 }
 0x624   : > { %2576 = vmatmul.mubr.msk.f32.vlgmr.msra.gmra.mrb[48].mxu1 %vm322_vm0, %v1904_v33  ;;  %2015 = vmatprep.mubr.f32.mxu0 %v3152_v16 }
 0x625   : > { %2104 = vmatprep.mubr.f32.mxu1 %v3152_v16 }
 0x627   : > { %2573 = vmatmul.mubr.msk.f32.gmra.mrb[50].mxu0 %vm322_vm0, %v1905_v36 }
 0x628   : > { %2577 = vmatmul.mubr.msk.f32.gmra.mrb[50].mxu1 %vm322_vm0, %v1905_v36  ;;  %2021 = vmatprep.mubr.f32.mxu0 %v3152_v16  ;;  %v2140_v36 = vld [vmem:[#allocation3 + $0xe0] sm:$0xff] }
 0x629   : > { %2110 = vmatprep.mubr.f32.mxu1 %v3152_v16 }
 0x62b   : > { %2574 = vmatmul.mubr.msk.f32.gmra.mrb[52].mxu0 %vm322_vm0, %v1906_v37 }
 0x62c   : > { %2578 = vmatmul.mubr.msk.f32.gmra.mrb[52].mxu1 %vm322_vm0, %v1906_v37  ;;  %2027 = vmatprep.mubr.f32.mxu0 %v3152_v16  ;;  %v2141_v37 = vld [vmem:[#allocation3 + $0xe8] sm:$0xff] }
 0x62d   : > { %2116 = vmatprep.mubr.f32.mxu1 %v3152_v16 }
 0x62f   : > { %2575 = vmatmul.mubr.msk.f32.gmra.mrb[54].mxu0 %vm322_vm0, %v1907_v38 }
 0x630   : > { %2579 = vmatmul.mubr.msk.f32.gmra.mrb[54].mxu1 %vm322_vm0, %v1907_v38  ;;  %2245 = vmatprep.mubr.f32.mxu0 %v3152_v16  ;;  %v2142_v38 = vld [vmem:[#allocation3 + $0xf0] sm:$0xff] }
 0x631   : > { %2334 = vmatprep.mubr.f32.mxu1 %v3152_v16 }
 0x6f6   : > { %v2011_v42 = vpop.f32.mrb[48].mxu0 }
 0x6f7   : > { %v2012_v43 = vadd.f32 %v2011_v42, %v1916_v40  ;;  %v2100_v44 = vpop.f32.mrb[48].mxu1  ;;  %v2013_v45 = vpop.f32.mrb[49].mxu0 }
 0x6f8   : > { %v2101_v46 = vadd.f32 %v2100_v44, %v1916_v40  ;;  %v2014_v47 = vadd.f32 %v2013_v45, %v1916_v40  ;;  %v2102_v21 = vpop.f32.mrb[49].mxu1  ;;  %v2152_v42 = vpop.permute.xlu0 %2151 }
 0x6f9   : > { %2988 = vtanh.f32 %v2012_v43  ;;  %v2103_v25 = vadd.f32 %v2102_v21, %v1916_v40  ;;  %v2143_v40 = vld [vmem:[#allocation3 + $0xf8] sm:$0xff] }
 0x6fa   : > { %2990 = vtanh.f32 %v2101_v46  ;;  %v2017_v30 = vpop.f32.mrb[50].mxu0 }
 0x6fb   : > { %2992 = vtanh.f32 %v2014_v47  ;;  %v2018_v34 = vadd.f32 %v2017_v30, %v1921_v26  ;;  %v2106_v35 = vpop.f32.mrb[50].mxu1  ;;  %v2019_v39 = vpop.f32.mrb[51].mxu0 }
 0x6fc   : > { %2994 = vtanh.f32 %v2103_v25  ;;  %v2107_v41 = vadd.f32 %v2106_v35, %v1921_v26  ;;  %v2020_v48 = vadd.f32 %v2019_v39, %v1921_v26  ;;  %v2108_v49 = vpop.f32.mrb[51].mxu1 }
 0x6fd   : > { %2996 = vtanh.f32 %v2018_v34  ;;  %v2109_v50 = vadd.f32 %v2108_v49, %v1921_v26  ;;  %v2157_v26 = vpop.permute.xlu1 %2156 }
 0x6fe   : > { %2998 = vtanh.f32 %v2107_v41  ;;  %v2023_v52 = vpop.f32.mrb[52].mxu0 }
 0x6ff   : > { %3000 = vtanh.f32 %v2020_v48  ;;  %v2024_v53 = vadd.f32 %v2023_v52, %v1926_v51  ;;  %v2112_v54 = vpop.f32.mrb[52].mxu1  ;;  %v2025_v55 = vpop.f32.mrb[53].mxu0 }
 0x700   : > { %3002 = vtanh.f32 %v2109_v50  ;;  %v2113_v56 = vadd.f32 %v2112_v54, %v1926_v51  ;;  %v2026_v57 = vadd.f32 %v2025_v55, %v1926_v51  ;;  %v2114_v58 = vpop.f32.mrb[53].mxu1 }
 0x701   : > { %3004 = vtanh.f32 %v2024_v53  ;;  %v2115_v59 = vadd.f32 %v2114_v58, %v1926_v51  ;;  %v2162_v51 = vpop.permute.xlu0 %2161 }
 0x702   : > { %3006 = vtanh.f32 %v2113_v56  ;;  %v2029_v61 = vpop.f32.mrb[54].mxu0 }
 0x703   : > { %v2989_v62 = vpop.eup %2988  ;;  %3008 = vtanh.f32 %v2026_v57  ;;  %v2030_v63 = vadd.f32 %v2029_v61, %v1931_v60  ;;  %v2118_v0 = vpop.f32.mrb[54].mxu1 }
 0x704   : > { %v2031_v1 = vpop.f32.mrb[55].mxu0  ;;  %v2991_v2 = vpop.eup %2990  ;;  %3010 = vtanh.f32 %v2115_v59  ;;  %v2119_v3 = vadd.f32 %v2118_v0, %v1931_v60 }
 0x705   : > { %v2032_v4 = vadd.f32 %v2031_v1, %v1931_v60  ;;  %v2120_v5 = vpop.f32.mrb[55].mxu1  ;;  %v2993_v6 = vpop.eup %2992  ;;  %3012 = vtanh.f32 %v2030_v63 }
 0x706   : > { %v2121_v7 = vadd.f32 %v2120_v5, %v1931_v60  ;;  %v2995_v8 = vpop.eup %2994  ;;  %3014 = vtanh.f32 %v2119_v3  ;;  %v2167_v60 = vpop.permute.xlu1 %2166 }
 0x707   : > { %v2997_v9 = vpop.eup %2996  ;;  %3016 = vtanh.f32 %v2032_v4 }
 0x708   : > { %v2999_v10 = vpop.eup %2998  ;;  %3018 = vtanh.f32 %v2121_v7  ;;  %v2729_v11 = vpack.c.bf16 %v2997_v9, %v2989_v62 }
 0x709   : > { %v3001_v12 = vpop.eup %3000  ;;  %v2737_v13 = vpack.c.bf16 %v2999_v10, %v2991_v2 }
 0x70a   : > { %v3003_v14 = vpop.eup %3002  ;;  %v2727_v15 = vpack.c.bf16 %v3001_v12, %v2993_v6 }
 0x70b   : > { %v3005_v17 = vpop.eup %3004  ;;  %v2735_v18 = vpack.c.bf16 %v3003_v14, %v2995_v8 }
 0x70c   : > { %v3007_v19 = vpop.eup %3006  ;;  %2728 = vmatprep.subr.bf16.mxu0 %v2727_v15 }
 0x70d   : > { %v3009_v20 = vpop.eup %3008  ;;  %2736 = vmatprep.subr.bf16.mxu1 %v2735_v18  ;;  %2730 = vmatpush1.bf16.msra.mxu0 %v2729_v11 }
 0x70e   : > { %v3011_v22 = vpop.eup %3010  ;;  %2738 = vmatpush1.bf16.msra.mxu1 %v2737_v13 }
 0x70f   : > { %v3013_v23 = vpop.eup %3012 }
 0x710   : > { %v3015_v24 = vpop.eup %3014  ;;  %v2733_v27 = vpack.c.bf16 %v3013_v23, %v3005_v17 }
 0x711   : > { %v3017_v28 = vpop.eup %3016  ;;  %v2741_v29 = vpack.c.bf16 %v3015_v24, %v3007_v19 }
 0x712   : > { %v3019_v31 = vpop.eup %3018  ;;  %v2731_v32 = vpack.c.bf16 %v3017_v28, %v3009_v20 }
 0x713   : > { %v2739_v33 = vpack.c.bf16 %v3019_v31, %v3011_v22 }
 0x714   : > { %2732 = vmatprep.subr.bf16.mxu0 %v2731_v32 }
 0x715   : > { %2740 = vmatprep.subr.bf16.mxu1 %v2739_v33  ;;  %2734 = vmatpush1.bf16.msra.mxu0 %v2733_v27 }
 0x716   : > { %2742 = vmatpush1.bf16.msra.mxu1 %v2741_v29 }
 0x718   : > { %2584 = vmatmul.mubr.msk.f32.vlgmr.msra.gmra.mrb[56].mxu0 %vm322_vm0, %v2140_v36 }
 0x719   : > { %2588 = vmatmul.mubr.msk.f32.vlgmr.msra.gmra.mrb[56].mxu1 %vm322_vm0, %v2140_v36  ;;  %2251 = vmatprep.mubr.f32.mxu0 %v3152_v16 }
 0x71a   : > { %2340 = vmatprep.mubr.f32.mxu1 %v3152_v16 }
 0x71c   : > { %2585 = vmatmul.mubr.msk.f32.gmra.mrb[58].mxu0 %vm322_vm0, %v2141_v37 }
 0x71d   : > { %2589 = vmatmul.mubr.msk.f32.gmra.mrb[58].mxu1 %vm322_vm0, %v2141_v37  ;;  %2257 = vmatprep.mubr.f32.mxu0 %v3152_v16 }
 0x71e   : > { %2346 = vmatprep.mubr.f32.mxu1 %v3152_v16 }
 0x720   : > { %2586 = vmatmul.mubr.msk.f32.gmra.mrb[60].mxu0 %vm322_vm0, %v2142_v38 }
 0x721   : > { %2590 = vmatmul.mubr.msk.f32.gmra.mrb[60].mxu1 %vm322_vm0, %v2142_v38  ;;  %2263 = vmatprep.mubr.f32.mxu0 %v3152_v16 }
 0x722   : > { %2352 = vmatprep.mubr.f32.mxu1 %v3152_v16 }
 0x724   : > { %2587 = vmatmul.mubr.msk.f32.gmra.mrb[62].mxu0 %vm322_vm0, %v2143_v40 }
 0x725   : > { %2591 = vmatmul.mubr.msk.f32.gmra.mrb[62].mxu1 %vm322_vm0, %v2143_v40 }
 0x7eb   : > { %v2247_v43 = vpop.f32.mrb[56].mxu0 }
 0x7ec   : > { %v2248_v44 = vadd.f32 %v2247_v43, %v2152_v42  ;;  %v2336_v45 = vpop.f32.mrb[56].mxu1  ;;  %v2249_v46 = vpop.f32.mrb[57].mxu0 }
 0x7ed   : > { %v2337_v47 = vadd.f32 %v2336_v45, %v2152_v42  ;;  %v2250_v21 = vadd.f32 %v2249_v46, %v2152_v42  ;;  %v2338_v25 = vpop.f32.mrb[57].mxu1 }
 0x7ee   : > { %2359 = vst [vmem:[%s3633_s30] sm:$0xff] %v2248_v44  ;;  %v2339_v16 = vadd.f32 %v2338_v25, %v2152_v42 }
 0x7ef   : > { %2361 = vst [vmem:[%s3633_s30 + $0x10] sm:$0xff] %v2337_v47  ;;  %2360 = vst [vmem:[%s3633_s30 + $0x8] sm:$0xff] %v2250_v21  ;;  %v2253_v30 = vpop.f32.mrb[58].mxu0 }
 0x7f0   : > { %2362 = vst [vmem:[%s3633_s30 + $0x18] sm:$0xff] %v2339_v16  ;;  %v2254_v34 = vadd.f32 %v2253_v30, %v2157_v26  ;;  %v2342_v35 = vpop.f32.mrb[58].mxu1  ;;  %v2255_v39 = vpop.f32.mrb[59].mxu0 }
 0x7f1   : > { %v2343_v41 = vadd.f32 %v2342_v35, %v2157_v26  ;;  %v2256_v48 = vadd.f32 %v2255_v39, %v2157_v26  ;;  %v2344_v49 = vpop.f32.mrb[59].mxu1 }
 0x7f2   : > { %2363 = vst [vmem:[%s3633_s30 + $0x20] sm:$0xff] %v2254_v34  ;;  %v2345_v50 = vadd.f32 %v2344_v49, %v2157_v26 }
 0x7f3   : > { %2365 = vst [vmem:[%s3633_s30 + $0x30] sm:$0xff] %v2343_v41  ;;  %2364 = vst [vmem:[%s3633_s30 + $0x28] sm:$0xff] %v2256_v48  ;;  %v2259_v52 = vpop.f32.mrb[60].mxu0 }
 0x7f4   : > { %2366 = vst [vmem:[%s3633_s30 + $0x38] sm:$0xff] %v2345_v50  ;;  %v2260_v53 = vadd.f32 %v2259_v52, %v2162_v51  ;;  %v2348_v54 = vpop.f32.mrb[60].mxu1  ;;  %v2261_v55 = vpop.f32.mrb[61].mxu0 }
 0x7f5   : > { %v2349_v56 = vadd.f32 %v2348_v54, %v2162_v51  ;;  %v2262_v57 = vadd.f32 %v2261_v55, %v2162_v51  ;;  %v2350_v58 = vpop.f32.mrb[61].mxu1 }
 0x7f6   : > { %2367 = vst [vmem:[%s3633_s30 + $0x40] sm:$0xff] %v2260_v53  ;;  %v2351_v59 = vadd.f32 %v2350_v58, %v2162_v51 }
 0x7f7   : > { %2369 = vst [vmem:[%s3633_s30 + $0x50] sm:$0xff] %v2349_v56  ;;  %2368 = vst [vmem:[%s3633_s30 + $0x48] sm:$0xff] %v2262_v57  ;;  %v2265_v61 = vpop.f32.mrb[62].mxu0 }
 0x7f8   : > { %2370 = vst [vmem:[%s3633_s30 + $0x58] sm:$0xff] %v2351_v59  ;;  %v2266_v62 = vadd.f32 %v2265_v61, %v2167_v60  ;;  %v2354_v63 = vpop.f32.mrb[62].mxu1  ;;  %v2267_v0 = vpop.f32.mrb[63].mxu0 }
 0x7f9   : > { %v2355_v1 = vadd.f32 %v2354_v63, %v2167_v60  ;;  %v2268_v2 = vadd.f32 %v2267_v0, %v2167_v60  ;;  %v2356_v3 = vpop.f32.mrb[63].mxu1 }
 0x7fa   : > { %2371 = vst [vmem:[%s3633_s30 + $0x60] sm:$0xff] %v2266_v62  ;;  %v2357_v4 = vadd.f32 %v2356_v3, %v2167_v60 }
 0x7fb   : > { %2373 = vst [vmem:[%s3633_s30 + $0x70] sm:$0xff] %v2355_v1  ;;  %2372 = vst [vmem:[%s3633_s30 + $0x68] sm:$0xff] %v2268_v2 }
 0x7fc   : > { %2374 = vst [vmem:[%s3633_s30 + $0x78] sm:$0xff] %v2357_v4 }
 0x7fd   : > { %3089 = shalt.err (!%p3086_p2)
}
 0x7fe   : > { %s3090_s7 = scalar_lea.hbm %s3652_s19, 2048  ;;  %s3094_s28 = scalar_lea.hbm %s3708_s4, 4096 }
 0x7ff   : > { %p3091_p0 = scmp.ne.s32.totalorder %s3652_s19, %s3090_s7  ;;  %p3095_p10 = scmp.lt.u32.totalorder %s3652_s19, %s3708_s4 }
 0x800   : > { %p3096_p11 = scmp.lt.u32.totalorder %s3094_s28, %s3090_s7  ;;  %p3098_p4 = scmp.lt.u32.totalorder %s3090_s7, %s3652_s19 }
 0x801   : > { %p3092_p5 = pnand %p3091_p0, %p3723_p3 }
 0x802   : > { %p3097_p12 = por %p3096_p11, %p3095_p10 }
 0x803   : > { %p3093_p6 = pneg %p3092_p5 }
 0x804   : > { %p3099_p7 = por %p3098_p4, %p3097_p12 }
 0x806   : > { %p3100_p8 = pnand %p3099_p7, %p3093_p6 }
 0x808   : > { %3103 = shalt.err (!%p3100_p8)
}
 0x809   : > { %s3155_s14 = smov 512   ;;  %s3156_s30 = smov 1024  }
 0x80a   : > { %s3157_s22 = smov 32  }
 0x80b   : > { %2767 = dma.vmem_to_hbm [thread:$0]  (%p3723_p3), %s3654_s20, 2048, %s3652_s19, %s3662_s8, %s3155_s14, %s3156_s30, %s3157_s22  }
 0x80c PF: > { %s2404_s29 = sand.u32 1, %s3134_s15   ;;  %p3724_p9 = scmp.ne.s32.totalorder %s3714_s27, 0 }
 0x80d   : > { %s2405_s6 = scalar_lea.sflag [#allocation5], %s2404_s29 }
 0x80e   : > { %p2777_p13 = pnand %p2483_p1, %p3724_p9 }
 0x810   : > { %3129 = dma.done.wait (!%p2777_p13), %s2405_s6, 2048  }
 0x811   : > { %3131 = vsyncadd (!%p2777_p13), %s2405_s6, 4294965248  ;;  %p16_p2 = scmp.ge.s32.totalorder %s3208_s21, 4   ;;  %s3725_s15 = smov %s3138_s16 }
 0x812   : > { %s3726_s16 = smov %s3142_s17  ;;  %s3727_s17 = smov %s3220_s24 }
 0x813   : > { %s3728_s18 = smov %s3208_s21  ;;  %18 = sbr.rel (!%p16_p2) target bundleno = 5 (0x5), region = 122 }
 0x81a   :  { %2410 = vsyncpa [#allocation4], 1 }
 0x81b   :  { %2412 = vsyncpa [#allocation4 + $0x1], 1 }
 0x81c   :  { %2413 = vsyncpa [#allocation7], 1 }
 0x81d   :  { %2414 = vsyncpa [#allocation5], 1 }
 0x81e   :  { %2416 = vsyncpa [#allocation5 + $0x1], 1 }

</bundles_post_ra>
